<compile_context>
chip_gen: v6e
topology: v6e:2x2x1
jax: 0.10.0
libtpu: 0.0.40
codegen_flags: <defaults>
</compile_context>

<pallas_src>
import functools

import jax
import jax.numpy as jnp
from jax.experimental import pallas as pl
from jax.experimental.pallas import tpu as pltpu


# ----------------------------- fused Pallas kernel -------------------------

def _basic_block_kernel(*refs, taps1, taps2, wc1, wp2, ho, wo, off_sc,
                        has_conv_shortcut):
    """Whole BasicBlock on one image, entirely in VMEM.

    refs (in order): x1, w1, b1, w2, b2, [ws, bs], out, y1f(scratch)

      x1_ref : (L1, C1)         bf16  flat, halo-padded conv1 input
      w1_ref : (T1, C1, Cout)   bf16  conv1 taps, BN1 scale folded in
      b1_ref : (1, Cout)        f32   folded BN1 bias
      w2_ref : (9, Cout, Cout)  bf16  conv2 taps, BN2 scale folded in
      b2_ref : (1, Cout)        f32
      ws_ref : (C1, Cout)       bf16  folded 1x1-shortcut weight (optional)
      bs_ref : (1, Cout)        f32   folded shortcut BN bias    (optional)
      o_ref  : (ho, wo, Cout)
      y1f    : (L2, Cout)       bf16  VMEM scratch: flat halo-padded y1
    """
    if has_conv_shortcut:
        x1_ref, w1_ref, b1_ref, w2_ref, b2_ref, ws_ref, bs_ref, o_ref, y1f = refs
    else:
        x1_ref, w1_ref, b1_ref, w2_ref, b2_ref, o_ref, y1f = refs
        ws_ref = bs_ref = None

    m1 = ho * wc1            # conv1 "wide" output rows (wc1 - wo garbage cols/row)
    m2 = ho * wp2            # conv2 "wide" output rows

    # ---- conv1 + BN1 + ReLU: per-tap GEMMs on contiguous row slices --------
    acc1 = jnp.dot(x1_ref[taps1[0]:taps1[0] + m1, :], w1_ref[0],
                   preferred_element_type=jnp.float32)
    for t in range(1, len(taps1)):
        off = taps1[t]
        acc1 = acc1 + jnp.dot(x1_ref[off:off + m1, :], w1_ref[t],
                              preferred_element_type=jnp.float32)
    y1 = jnp.maximum(acc1 + b1_ref[...], 0.0).astype(jnp.bfloat16)

    # ---- y1 never leaves VMEM: drop garbage columns and place the valid ----
    # ---- wo columns of each row into a zeroed halo-padded flat scratch  ----
    y1f[...] = jnp.zeros(y1f.shape, y1f.dtype)
    for oh in range(ho):
        dst = (oh + 1) * wp2 + 1
        y1f[dst:dst + wo, :] = y1[oh * wc1:oh * wc1 + wo, :]

    # ---- conv2 + BN2 bias (same contiguous-tap-GEMM scheme) ----------------
    acc2 = jnp.dot(y1f[taps2[0]:taps2[0] + m2, :], w2_ref[0],
                   preferred_element_type=jnp.float32)
    for t in range(1, len(taps2)):
        off = taps2[t]
        acc2 = acc2 + jnp.dot(y1f[off:off + m2, :], w2_ref[t],
                              preferred_element_type=jnp.float32)
    acc2 = acc2 + b2_ref[...]

    # ---- shortcut fused in the epilogue ------------------------------------
    if has_conv_shortcut:
        sc = jnp.dot(x1_ref[off_sc:off_sc + m1, :], ws_ref[...],
                     preferred_element_type=jnp.float32) + bs_ref[...]
    else:
        sc = x1_ref[off_sc:off_sc + m1, :].astype(jnp.float32)

    # ---- residual add + final ReLU, store only the valid columns -----------
    for oh in range(ho):
        r2 = acc2[oh * wp2:oh * wp2 + wo, :]
        rs = sc[oh * wc1:oh * wc1 + wo, :]
        o_ref[oh, :, :] = jnp.maximum(r2 + rs, 0.0).astype(o_ref.dtype)


def _fused_block_call(x1, prep, *, ho, wo, wc1, taps1, taps2, off_sc,
                      out_dtype):
    n, l1, c1 = x1.shape
    cout = prep["b1"].shape[-1]
    wp2 = wo + 2
    l2 = (ho + 2) * wp2 + 2                    # covers last conv2 tap's slice
    has_sc = "ws" in prep

    kernel = functools.partial(
        _basic_block_kernel, taps1=taps1, taps2=taps2, wc1=wc1, wp2=wp2,
        ho=ho, wo=wo, off_sc=off_sc, has_conv_shortcut=has_sc)

    in_specs = [
        pl.BlockSpec((None, l1, c1), lambda i: (i, 0, 0)),
        pl.BlockSpec(prep["w1"].shape, lambda i: (0, 0, 0)),
        pl.BlockSpec(prep["b1"].shape, lambda i: (0, 0)),
        pl.BlockSpec(prep["w2"].shape, lambda i: (0, 0, 0)),
        pl.BlockSpec(prep["b2"].shape, lambda i: (0, 0)),
    ]
    args = [x1, prep["w1"], prep["b1"], prep["w2"], prep["b2"]]
    if has_sc:
        in_specs += [pl.BlockSpec(prep["ws"].shape, lambda i: (0, 0)),
                     pl.BlockSpec(prep["bs"].shape, lambda i: (0, 0))]
        args += [prep["ws"], prep["bs"]]

    flops = 2 * n * (ho * wc1 * len(taps1) * c1 * cout
                     + ho * wp2 * 9 * cout * cout
                     + (ho * wc1 * c1 * cout if has_sc else 0))
    in_bytes = sum(int(a.size) * a.dtype.itemsize for a in args)
    out_bytes = n * ho * wo * cout * jnp.dtype(out_dtype).itemsize
    cost = pl.CostEstimate(flops=int(flops), transcendentals=0,
                           bytes_accessed=int(in_bytes + out_bytes))

    return pl.pallas_call(
        kernel,
        out_shape=jax.ShapeDtypeStruct((n, ho, wo, cout), out_dtype),
        grid=(n,),
        in_specs=in_specs,
        out_specs=pl.BlockSpec((None, ho, wo, cout), lambda i: (i, 0, 0, 0)),
        scratch_shapes=[pltpu.VMEM((l2, cout), jnp.bfloat16)],
        compiler_params=pltpu.CompilerParams(
            dimension_semantics=("parallel",)),
        cost_estimate=cost,
    )(*args)


# --------------------- Parameter prep (one-time, JAX) -----------------------

def fold_bn(gamma, beta, mean, var, eps=1e-5):
    scale = gamma / jnp.sqrt(var + eps)
    return scale, beta - mean * scale


def _w3x3_taps(w_oihw, scale):
    """(Cout,Cin,3,3) -> (9, Cin, Cout) bf16 taps, BN scale folded in."""
    cout, cin, kh, kw = w_oihw.shape
    w = jnp.transpose(w_oihw, (2, 3, 1, 0)).reshape(kh * kw, cin, cout)
    return (w * scale[None, None, :]).astype(jnp.bfloat16)


def _w3x3_s2_taps(w_oihw, scale):
    """Stride-2 3x3 conv as a stride-1 2x2-tap conv over the space-to-depth
    (2x2) padded input: tap t = dh*2+dw, channel block (a*2+b)*Cin maps to
    original tap (2dh+a, 2dw+b); out-of-range taps get zero weights."""
    cout, cin, _, _ = w_oihw.shape
    w = w_oihw * scale[:, None, None, None]
    taps = jnp.zeros((4, 4 * cin, cout), w.dtype)
    for dh in range(2):
        for dw in range(2):
            for a in range(2):
                for b in range(2):
                    ki, kj = 2 * dh + a, 2 * dw + b
                    if ki < 3 and kj < 3:
                        taps = taps.at[
                            dh * 2 + dw,
                            (a * 2 + b) * cin:(a * 2 + b + 1) * cin, :
                        ].set(w[:, :, ki, kj].T)
    return taps.astype(jnp.bfloat16)


def prepare_params(params, stride):
    """Fold BN scale into bf16 tap weights.  No channel padding."""
    out_ch, in_ch = params["w1"].shape[:2]
    s1, b1 = fold_bn(*params["bn1"])
    s2, b2 = fold_bn(*params["bn2"])
    if stride == 1:
        w1 = _w3x3_taps(params["w1"], s1)                  # (9, cin, out)
    elif stride == 2:
        w1 = _w3x3_s2_taps(params["w1"], s1)               # (4, 4cin, out)
    else:
        raise NotImplementedError("BasicBlock stride must be 1 or 2")
    prep = {
        "w1": w1,
        "b1": b1[None, :].astype(jnp.float32),
        "w2": _w3x3_taps(params["w2"], s2),                # (9, out, out)
        "b2": b2[None, :].astype(jnp.float32),
    }
    if stride != 1 or in_ch != out_ch:
        ss, bs = fold_bn(*params["bns"])
        ws = params["ws"][:, :, 0, 0].T * ss[None, :]      # (cin, out)
        if stride == 2:
            # embed into the 4*cin space-to-depth channels (quadrant a=b=1).
            full = jnp.zeros((4 * in_ch, out_ch), ws.dtype)
            ws = full.at[3 * in_ch:4 * in_ch, :].set(ws)
        prep["ws"] = ws.astype(jnp.bfloat16)
        prep["bs"] = bs[None, :].astype(jnp.float32)
    return prep


# ------------------------------- Forward ------------------------------------

def basic_block_forward(x_nchw, prep, stride):
    n, cin, h, w = x_nchw.shape
    ho, wo = h // stride, w // stride

    x = jnp.transpose(x_nchw, (0, 2, 3, 1)).astype(jnp.bfloat16)   # NHWC bf16
    xp = jnp.pad(x, ((0, 0), (1, 1), (1, 1), (0, 0)))              # halo pad

    if stride == 1:
        hc1, wc1, c1 = h + 2, w + 2, cin
        x1 = xp.reshape(n, hc1 * wc1, c1)
        taps1 = tuple(ki * wc1 + kj for ki in range(3) for kj in range(3))
        off_sc = wc1 + 1                     # shortcut reads x[oh, ow]
    elif stride == 2:
        assert h % 2 == 0 and w % 2 == 0
        hp, wp = h + 2, w + 2
        z = xp.reshape(n, hp // 2, 2, wp // 2, 2, cin)
        z = z.transpose(0, 1, 3, 2, 4, 5).reshape(n, hp // 2, wp // 2, 4 * cin)
        hc1, wc1, c1 = hp // 2, wp // 2, 4 * cin
        x1 = z.reshape(n, hc1 * wc1, c1)
        taps1 = tuple(dh * wc1 + dw for dh in range(2) for dw in range(2))
        off_sc = 0                           # x[2oh, 2ow] = quadrant (1,1) of tap (0,0)
    else:
        raise NotImplementedError("BasicBlock stride must be 1 or 2")

    m1 = ho * wc1
    l1 = taps1[-1] + m1                      # last tap's slice end
    x1 = jnp.pad(x1, ((0, 0), (0, l1 - hc1 * wc1), (0, 0)))

    wp2 = wo + 2
    taps2 = tuple(ki * wp2 + kj for ki in range(3) for kj in range(3))

    out = _fused_block_call(x1, prep, ho=ho, wo=wo, wc1=wc1, taps1=taps1,
                            taps2=taps2, off_sc=off_sc, out_dtype=jnp.float32)
    return jnp.transpose(out, (0, 3, 1, 2))                        # NHWC -> NCHW


# ----------------------------- Reference (JAX) ------------------------------

def reference_forward(x, params, stride, compute_dtype=jnp.float32):
    """Plain-JAX reference. compute_dtype=bfloat16 mirrors the kernel's bf16
    matmul inputs (with f32 accumulation) for a tighter comparison."""
    def conv(a, w, s, pad):
        return jax.lax.conv_general_dilated(
            a.astype(compute_dtype), w.astype(compute_dtype), (s, s),
            ((pad, pad), (pad, pad)),
            dimension_numbers=("NCHW", "OIHW", "NCHW"),
            preferred_element_type=jnp.float32)

    def bn(y, gamma, beta, mean, var, eps=1e-5):
        s = gamma / jnp.sqrt(var + eps)
        b = beta - mean * s
        return y * s[None, :, None, None] + b[None, :, None, None]

    in_ch, out_ch = x.shape[1], params["w1"].shape[0]
    r = jnp.maximum(bn(conv(x, params["w1"], stride, 1), *params["bn1"]), 0.0)
    r = bn(conv(r, params["w2"], 1, 1), *params["bn2"])
    if stride != 1 or in_ch != out_ch:
        sc = bn(conv(x, params["ws"], stride, 0), *params["bns"])
    else:
        sc = x.astype(compute_dtype).astype(jnp.float32)
    return jnp.maximum(r + sc, 0.0)


# ---------------------------------- Main ------------------------------------

def init_params(key, in_ch, out_ch):
    ks = jax.random.split(key, 12)
    def bn_params(k0, k1, k2, k3, c):
        gamma = 1.0 + 0.1 * jax.random.normal(k0, (c,), jnp.float32)
        beta = 0.1 * jax.random.normal(k1, (c,), jnp.float32)
        mean = 0.1 * jax.random.normal(k2, (c,), jnp.float32)
        var = 0.5 + jax.random.uniform(k3, (c,), jnp.float32)
        return (gamma, beta, mean, var)
    return {
        "w1": 0.1 * jax.random.normal(ks[0], (out_ch, in_ch, 3, 3), jnp.float32),
        "bn1": bn_params(ks[1], ks[2], ks[3], ks[4], out_ch),
        "w2": 0.1 * jax.random.normal(ks[5], (out_ch, out_ch, 3, 3), jnp.float32),
        "bn2": bn_params(ks[6], ks[7], ks[8], ks[9], out_ch),
        "ws": 0.1 * jax.random.normal(ks[10], (out_ch, in_ch, 1, 1), jnp.float32),
        "bns": bn_params(ks[11], ks[1], ks[5], ks[10], out_ch),
    }


if __name__ == "__main__":
    key = jax.random.PRNGKey(0)
    fwd = jax.jit(basic_block_forward, static_argnums=(2,))

    configs = [
        # (N, in_ch, out_ch, H, W, stride)
        (2, 4, 8, 16, 16, 2),   # downsample block: stride-2 + 1x1-conv shortcut
        (2, 8, 8, 16, 16, 1),   # identity shortcut
        (2, 4, 8, 16, 16, 1),   # stride-1 channel change: 1x1-conv shortcut
    ]
    for idx, (n, cin, cout, h, w, stride) in enumerate(configs):
        k_x, k_p = jax.random.split(jax.random.fold_in(key, idx))
        x = jax.random.normal(k_x, (n, cin, h, w), jnp.float32)
        params = init_params(k_p, cin, cout)

        prep = prepare_params(params, stride)          # one-time BN/weight folding
        out = jax.block_until_ready(fwd(x, prep, stride))

        ref_bf16 = jax.block_until_ready(
            reference_forward(x, params, stride, compute_dtype=jnp.bfloat16))
        ref_f32 = jax.block_until_ready(reference_forward(x, params, stride))

        assert out.shape == (n, cout, h // stride, w // stride), (idx, out.shape)
        # Tight check vs a reference using matching bf16 matmul inputs, plus a
        # looser sanity check vs the pure-f32 reference (bf16 quantization).
        assert jnp.allclose(out, ref_bf16, atol=3e-2, rtol=3e-2), \
            f"config {idx}: mismatch vs bf16 reference"
        assert jnp.allclose(out, ref_f32, atol=8e-2, rtol=8e-2), \
            f"config {idx}: mismatch vs f32 reference"

    print("KERNEL_OK")
</pallas_src>

<mosaic_0001>
module attributes {stable_mosaic.version = 11 : i64} {
  func.func @_basic_block_kernel(%arg0: i32, %arg1: memref<1x82x16xbf16, #tpu.memory_space<vmem>>, %arg2: memref<4x16x8xbf16, #tpu.memory_space<vmem>>, %arg3: memref<1x8xf32, #tpu.memory_space<vmem>>, %arg4: memref<9x8x8xbf16, #tpu.memory_space<vmem>>, %arg5: memref<1x8xf32, #tpu.memory_space<vmem>>, %arg6: memref<16x8xbf16, #tpu.memory_space<vmem>>, %arg7: memref<1x8xf32, #tpu.memory_space<vmem>>, %arg8: memref<1x8x8x8xf32, #tpu.memory_space<vmem>>, %arg9: memref<102x8xbf16, #tpu.memory_space<vmem>>) attributes {dimension_semantics = [#tpu.dimension_semantics<parallel>], iteration_bounds = array<i64: 2>, scalar_prefetch = 0 : i64, scratch_operands = 1 : i64, tpu.core_type = #tpu.core_type<tc>, window_params = [{transform_indices = @transform_0, window_bounds = array<i64: 1, 82, 16>}, {pipeline_mode = #tpu.pipeline_mode<synchronous>, transform_indices = @transform_1, window_bounds = array<i64: 4, 16, 8>}, {pipeline_mode = #tpu.pipeline_mode<synchronous>, transform_indices = @transform_2, window_bounds = array<i64: 1, 8>}, {pipeline_mode = #tpu.pipeline_mode<synchronous>, transform_indices = @transform_3, window_bounds = array<i64: 9, 8, 8>}, {pipeline_mode = #tpu.pipeline_mode<synchronous>, transform_indices = @transform_4, window_bounds = array<i64: 1, 8>}, {pipeline_mode = #tpu.pipeline_mode<synchronous>, transform_indices = @transform_5, window_bounds = array<i64: 16, 8>}, {pipeline_mode = #tpu.pipeline_mode<synchronous>, transform_indices = @transform_6, window_bounds = array<i64: 1, 8>}, {transform_indices = @transform_7, window_bounds = array<i64: 1, 8, 8, 8>}]} {
    %c0 = arith.constant 0 : index
    %c0_0 = arith.constant 0 : index
    %c0_1 = arith.constant 0 : index
    %0 = vector.load %arg1[%c0, %c0_0, %c0_1] : memref<1x82x16xbf16, #tpu.memory_space<vmem>>, vector<1x72x16xbf16>
    %1 = vector.shape_cast %0 : vector<1x72x16xbf16> to vector<72x16xbf16>
    %c0_2 = arith.constant 0 : index
    %c0_3 = arith.constant 0 : index
    %c0_4 = arith.constant 0 : index
    %2 = vector.load %arg2[%c0_2, %c0_3, %c0_4] : memref<4x16x8xbf16, #tpu.memory_space<vmem>>, vector<1x16x8xbf16>
    %3 = vector.shape_cast %2 : vector<1x16x8xbf16> to vector<16x8xbf16>
    %cst = arith.constant dense<0.000000e+00> : vector<72x8xf32>
    %4 = tpu.matmul %1, %3, %cst {dimension_numbers = #tpu.dot_dimension_numbers<[1], [0], [0], [1], [0, 0, 1, 1], [], []>} : vector<72x16xbf16>, vector<16x8xbf16>, vector<72x8xf32> -> vector<72x8xf32>
    %c0_5 = arith.constant 0 : index
    %c1 = arith.constant 1 : index
    %c0_6 = arith.constant 0 : index
    %5 = vector.load %arg1[%c0_5, %c1, %c0_6] : memref<1x82x16xbf16, #tpu.memory_space<vmem>>, vector<1x72x16xbf16>
    %6 = vector.shape_cast %5 : vector<1x72x16xbf16> to vector<72x16xbf16>
    %c1_7 = arith.constant 1 : index
    %c0_8 = arith.constant 0 : index
    %c0_9 = arith.constant 0 : index
    %7 = vector.load %arg2[%c1_7, %c0_8, %c0_9] : memref<4x16x8xbf16, #tpu.memory_space<vmem>>, vector<1x16x8xbf16>
    %8 = vector.shape_cast %7 : vector<1x16x8xbf16> to vector<16x8xbf16>
    %cst_10 = arith.constant dense<0.000000e+00> : vector<72x8xf32>
    %9 = tpu.matmul %6, %8, %cst_10 {dimension_numbers = #tpu.dot_dimension_numbers<[1], [0], [0], [1], [0, 0, 1, 1], [], []>} : vector<72x16xbf16>, vector<16x8xbf16>, vector<72x8xf32> -> vector<72x8xf32>
    %10 = arith.addf %4, %9 : vector<72x8xf32>
    %c0_11 = arith.constant 0 : index
    %c9 = arith.constant 9 : index
    %c0_12 = arith.constant 0 : index
    %11 = vector.load %arg1[%c0_11, %c9, %c0_12] : memref<1x82x16xbf16, #tpu.memory_space<vmem>>, vector<1x72x16xbf16>
    %12 = vector.shape_cast %11 : vector<1x72x16xbf16> to vector<72x16xbf16>
    %c2 = arith.constant 2 : index
    %c0_13 = arith.constant 0 : index
    %c0_14 = arith.constant 0 : index
    %13 = vector.load %arg2[%c2, %c0_13, %c0_14] : memref<4x16x8xbf16, #tpu.memory_space<vmem>>, vector<1x16x8xbf16>
    %14 = vector.shape_cast %13 : vector<1x16x8xbf16> to vector<16x8xbf16>
    %cst_15 = arith.constant dense<0.000000e+00> : vector<72x8xf32>
    %15 = tpu.matmul %12, %14, %cst_15 {dimension_numbers = #tpu.dot_dimension_numbers<[1], [0], [0], [1], [0, 0, 1, 1], [], []>} : vector<72x16xbf16>, vector<16x8xbf16>, vector<72x8xf32> -> vector<72x8xf32>
    %16 = arith.addf %10, %15 : vector<72x8xf32>
    %c0_16 = arith.constant 0 : index
    %c10 = arith.constant 10 : index
    %c0_17 = arith.constant 0 : index
    %17 = vector.load %arg1[%c0_16, %c10, %c0_17] : memref<1x82x16xbf16, #tpu.memory_space<vmem>>, vector<1x72x16xbf16>
    %18 = vector.shape_cast %17 : vector<1x72x16xbf16> to vector<72x16xbf16>
    %c3 = arith.constant 3 : index
    %c0_18 = arith.constant 0 : index
    %c0_19 = arith.constant 0 : index
    %19 = vector.load %arg2[%c3, %c0_18, %c0_19] : memref<4x16x8xbf16, #tpu.memory_space<vmem>>, vector<1x16x8xbf16>
    %20 = vector.shape_cast %19 : vector<1x16x8xbf16> to vector<16x8xbf16>
    %cst_20 = arith.constant dense<0.000000e+00> : vector<72x8xf32>
    %21 = tpu.matmul %18, %20, %cst_20 {dimension_numbers = #tpu.dot_dimension_numbers<[1], [0], [0], [1], [0, 0, 1, 1], [], []>} : vector<72x16xbf16>, vector<16x8xbf16>, vector<72x8xf32> -> vector<72x8xf32>
    %22 = arith.addf %16, %21 : vector<72x8xf32>
    %c0_21 = arith.constant 0 : index
    %c0_22 = arith.constant 0 : index
    %23 = vector.load %arg3[%c0_21, %c0_22] : memref<1x8xf32, #tpu.memory_space<vmem>>, vector<1x8xf32>
    %24 = vector.broadcast %23 : vector<1x8xf32> to vector<72x8xf32>
    %25 = arith.addf %22, %24 : vector<72x8xf32>
    %cst_23 = arith.constant 0.000000e+00 : f32
    %26 = vector.broadcast %cst_23 : f32 to vector<72x8xf32>
    %27 = arith.maximumf %25, %26 : vector<72x8xf32>
    %28 = arith.truncf %27 : vector<72x8xf32> to vector<72x8xbf16>
    %cst_24 = arith.constant 0.000000e+00 : bf16
    %29 = vector.broadcast %cst_24 : bf16 to vector<102x8xbf16>
    %c0_25 = arith.constant 0 : index
    %c0_26 = arith.constant 0 : index
    %30 = vector.load %arg9[%c0_25, %c0_26] : memref<102x8xbf16, #tpu.memory_space<vmem>>, vector<102x8xbf16>
    tpu.vector_store %arg9[%c0_25, %c0_26], %29 {strides = array<i32>} : memref<102x8xbf16, #tpu.memory_space<vmem>>, vector<102x8xbf16>,
    %31 = vector.extract_strided_slice %28 {offsets = [0, 0], sizes = [8, 8], strides = [1, 1]} : vector<72x8xbf16> to vector<8x8xbf16>
    %c11 = arith.constant 11 : index
    %c0_27 = arith.constant 0 : index
    %32 = vector.load %arg9[%c11, %c0_27] : memref<102x8xbf16, #tpu.memory_space<vmem>>, vector<8x8xbf16>
    tpu.vector_store %arg9[%c11, %c0_27], %31 {strides = array<i32>} : memref<102x8xbf16, #tpu.memory_space<vmem>>, vector<8x8xbf16>,
    %33 = vector.extract_strided_slice %28 {offsets = [9, 0], sizes = [8, 8], strides = [1, 1]} : vector<72x8xbf16> to vector<8x8xbf16>
    %c21 = arith.constant 21 : index
    %c0_28 = arith.constant 0 : index
    %34 = vector.load %arg9[%c21, %c0_28] : memref<102x8xbf16, #tpu.memory_space<vmem>>, vector<8x8xbf16>
    tpu.vector_store %arg9[%c21, %c0_28], %33 {strides = array<i32>} : memref<102x8xbf16, #tpu.memory_space<vmem>>, vector<8x8xbf16>,
    %35 = vector.extract_strided_slice %28 {offsets = [18, 0], sizes = [8, 8], strides = [1, 1]} : vector<72x8xbf16> to vector<8x8xbf16>
    %c31 = arith.constant 31 : index
    %c0_29 = arith.constant 0 : index
    %36 = vector.load %arg9[%c31, %c0_29] : memref<102x8xbf16, #tpu.memory_space<vmem>>, vector<8x8xbf16>
    tpu.vector_store %arg9[%c31, %c0_29], %35 {strides = array<i32>} : memref<102x8xbf16, #tpu.memory_space<vmem>>, vector<8x8xbf16>,
    %37 = vector.extract_strided_slice %28 {offsets = [27, 0], sizes = [8, 8], strides = [1, 1]} : vector<72x8xbf16> to vector<8x8xbf16>
    %c41 = arith.constant 41 : index
    %c0_30 = arith.constant 0 : index
    %38 = vector.load %arg9[%c41, %c0_30] : memref<102x8xbf16, #tpu.memory_space<vmem>>, vector<8x8xbf16>
    tpu.vector_store %arg9[%c41, %c0_30], %37 {strides = array<i32>} : memref<102x8xbf16, #tpu.memory_space<vmem>>, vector<8x8xbf16>,
    %39 = vector.extract_strided_slice %28 {offsets = [36, 0], sizes = [8, 8], strides = [1, 1]} : vector<72x8xbf16> to vector<8x8xbf16>
    %c51 = arith.constant 51 : index
    %c0_31 = arith.constant 0 : index
    %40 = vector.load %arg9[%c51, %c0_31] : memref<102x8xbf16, #tpu.memory_space<vmem>>, vector<8x8xbf16>
    tpu.vector_store %arg9[%c51, %c0_31], %39 {strides = array<i32>} : memref<102x8xbf16, #tpu.memory_space<vmem>>, vector<8x8xbf16>,
    %41 = vector.extract_strided_slice %28 {offsets = [45, 0], sizes = [8, 8], strides = [1, 1]} : vector<72x8xbf16> to vector<8x8xbf16>
    %c61 = arith.constant 61 : index
    %c0_32 = arith.constant 0 : index
    %42 = vector.load %arg9[%c61, %c0_32] : memref<102x8xbf16, #tpu.memory_space<vmem>>, vector<8x8xbf16>
    tpu.vector_store %arg9[%c61, %c0_32], %41 {strides = array<i32>} : memref<102x8xbf16, #tpu.memory_space<vmem>>, vector<8x8xbf16>,
    %43 = vector.extract_strided_slice %28 {offsets = [54, 0], sizes = [8, 8], strides = [1, 1]} : vector<72x8xbf16> to vector<8x8xbf16>
    %c71 = arith.constant 71 : index
    %c0_33 = arith.constant 0 : index
    %44 = vector.load %arg9[%c71, %c0_33] : memref<102x8xbf16, #tpu.memory_space<vmem>>, vector<8x8xbf16>
    tpu.vector_store %arg9[%c71, %c0_33], %43 {strides = array<i32>} : memref<102x8xbf16, #tpu.memory_space<vmem>>, vector<8x8xbf16>,
    %45 = vector.extract_strided_slice %28 {offsets = [63, 0], sizes = [8, 8], strides = [1, 1]} : vector<72x8xbf16> to vector<8x8xbf16>
    %c81 = arith.constant 81 : index
    %c0_34 = arith.constant 0 : index
    %46 = vector.load %arg9[%c81, %c0_34] : memref<102x8xbf16, #tpu.memory_space<vmem>>, vector<8x8xbf16>
    tpu.vector_store %arg9[%c81, %c0_34], %45 {strides = array<i32>} : memref<102x8xbf16, #tpu.memory_space<vmem>>, vector<8x8xbf16>,
    %c0_35 = arith.constant 0 : index
    %c0_36 = arith.constant 0 : index
    %47 = vector.load %arg9[%c0_35, %c0_36] : memref<102x8xbf16, #tpu.memory_space<vmem>>, vector<80x8xbf16>
    %c0_37 = arith.constant 0 : index
    %c0_38 = arith.constant 0 : index
    %c0_39 = arith.constant 0 : index
    %48 = vector.load %arg4[%c0_37, %c0_38, %c0_39] : memref<9x8x8xbf16, #tpu.memory_space<vmem>>, vector<1x8x8xbf16>
    %49 = vector.shape_cast %48 : vector<1x8x8xbf16> to vector<8x8xbf16>
    %cst_40 = arith.constant dense<0.000000e+00> : vector<80x8xf32>
    %50 = tpu.matmul %47, %49, %cst_40 {dimension_numbers = #tpu.dot_dimension_numbers<[1], [0], [0], [1], [0, 0, 1, 1], [], []>} : vector<80x8xbf16>, vector<8x8xbf16>, vector<80x8xf32> -> vector<80x8xf32>
    %c1_41 = arith.constant 1 : index
    %c0_42 = arith.constant 0 : index
    %51 = vector.load %arg9[%c1_41, %c0_42] : memref<102x8xbf16, #tpu.memory_space<vmem>>, vector<80x8xbf16>
    %c1_43 = arith.constant 1 : index
    %c0_44 = arith.constant 0 : index
    %c0_45 = arith.constant 0 : index
    %52 = vector.load %arg4[%c1_43, %c0_44, %c0_45] : memref<9x8x8xbf16, #tpu.memory_space<vmem>>, vector<1x8x8xbf16>
    %53 = vector.shape_cast %52 : vector<1x8x8xbf16> to vector<8x8xbf16>
    %cst_46 = arith.constant dense<0.000000e+00> : vector<80x8xf32>
    %54 = tpu.matmul %51, %53, %cst_46 {dimension_numbers = #tpu.dot_dimension_numbers<[1], [0], [0], [1], [0, 0, 1, 1], [], []>} : vector<80x8xbf16>, vector<8x8xbf16>, vector<80x8xf32> -> vector<80x8xf32>
    %55 = arith.addf %50, %54 : vector<80x8xf32>
    %c2_47 = arith.constant 2 : index
    %c0_48 = arith.constant 0 : index
    %56 = vector.load %arg9[%c2_47, %c0_48] : memref<102x8xbf16, #tpu.memory_space<vmem>>, vector<80x8xbf16>
    %c2_49 = arith.constant 2 : index
    %c0_50 = arith.constant 0 : index
    %c0_51 = arith.constant 0 : index
    %57 = vector.load %arg4[%c2_49, %c0_50, %c0_51] : memref<9x8x8xbf16, #tpu.memory_space<vmem>>, vector<1x8x8xbf16>
    %58 = vector.shape_cast %57 : vector<1x8x8xbf16> to vector<8x8xbf16>
    %cst_52 = arith.constant dense<0.000000e+00> : vector<80x8xf32>
    %59 = tpu.matmul %56, %58, %cst_52 {dimension_numbers = #tpu.dot_dimension_numbers<[1], [0], [0], [1], [0, 0, 1, 1], [], []>} : vector<80x8xbf16>, vector<8x8xbf16>, vector<80x8xf32> -> vector<80x8xf32>
    %60 = arith.addf %55, %59 : vector<80x8xf32>
    %c10_53 = arith.constant 10 : index
    %c0_54 = arith.constant 0 : index
    %61 = vector.load %arg9[%c10_53, %c0_54] : memref<102x8xbf16, #tpu.memory_space<vmem>>, vector<80x8xbf16>
    %c3_55 = arith.constant 3 : index
    %c0_56 = arith.constant 0 : index
    %c0_57 = arith.constant 0 : index
    %62 = vector.load %arg4[%c3_55, %c0_56, %c0_57] : memref<9x8x8xbf16, #tpu.memory_space<vmem>>, vector<1x8x8xbf16>
    %63 = vector.shape_cast %62 : vector<1x8x8xbf16> to vector<8x8xbf16>
    %cst_58 = arith.constant dense<0.000000e+00> : vector<80x8xf32>
    %64 = tpu.matmul %61, %63, %cst_58 {dimension_numbers = #tpu.dot_dimension_numbers<[1], [0], [0], [1], [0, 0, 1, 1], [], []>} : vector<80x8xbf16>, vector<8x8xbf16>, vector<80x8xf32> -> vector<80x8xf32>
    %65 = arith.addf %60, %64 : vector<80x8xf32>
    %c11_59 = arith.constant 11 : index
    %c0_60 = arith.constant 0 : index
    %66 = vector.load %arg9[%c11_59, %c0_60] : memref<102x8xbf16, #tpu.memory_space<vmem>>, vector<80x8xbf16>
    %c4 = arith.constant 4 : index
    %c0_61 = arith.constant 0 : index
    %c0_62 = arith.constant 0 : index
    %67 = vector.load %arg4[%c4, %c0_61, %c0_62] : memref<9x8x8xbf16, #tpu.memory_space<vmem>>, vector<1x8x8xbf16>
    %68 = vector.shape_cast %67 : vector<1x8x8xbf16> to vector<8x8xbf16>
    %cst_63 = arith.constant dense<0.000000e+00> : vector<80x8xf32>
    %69 = tpu.matmul %66, %68, %cst_63 {dimension_numbers = #tpu.dot_dimension_numbers<[1], [0], [0], [1], [0, 0, 1, 1], [], []>} : vector<80x8xbf16>, vector<8x8xbf16>, vector<80x8xf32> -> vector<80x8xf32>
    %70 = arith.addf %65, %69 : vector<80x8xf32>
    %c12 = arith.constant 12 : index
    %c0_64 = arith.constant 0 : index
    %71 = vector.load %arg9[%c12, %c0_64] : memref<102x8xbf16, #tpu.memory_space<vmem>>, vector<80x8xbf16>
    %c5 = arith.constant 5 : index
    %c0_65 = arith.constant 0 : index
    %c0_66 = arith.constant 0 : index
    %72 = vector.load %arg4[%c5, %c0_65, %c0_66] : memref<9x8x8xbf16, #tpu.memory_space<vmem>>, vector<1x8x8xbf16>
    %73 = vector.shape_cast %72 : vector<1x8x8xbf16> to vector<8x8xbf16>
    %cst_67 = arith.constant dense<0.000000e+00> : vector<80x8xf32>
    %74 = tpu.matmul %71, %73, %cst_67 {dimension_numbers = #tpu.dot_dimension_numbers<[1], [0], [0], [1], [0, 0, 1, 1], [], []>} : vector<80x8xbf16>, vector<8x8xbf16>, vector<80x8xf32> -> vector<80x8xf32>
    %75 = arith.addf %70, %74 : vector<80x8xf32>
    %c20 = arith.constant 20 : index
    %c0_68 = arith.constant 0 : index
    %76 = vector.load %arg9[%c20, %c0_68] : memref<102x8xbf16, #tpu.memory_space<vmem>>, vector<80x8xbf16>
    %c6 = arith.constant 6 : index
    %c0_69 = arith.constant 0 : index
    %c0_70 = arith.constant 0 : index
    %77 = vector.load %arg4[%c6, %c0_69, %c0_70] : memref<9x8x8xbf16, #tpu.memory_space<vmem>>, vector<1x8x8xbf16>
    %78 = vector.shape_cast %77 : vector<1x8x8xbf16> to vector<8x8xbf16>
    %cst_71 = arith.constant dense<0.000000e+00> : vector<80x8xf32>
    %79 = tpu.matmul %76, %78, %cst_71 {dimension_numbers = #tpu.dot_dimension_numbers<[1], [0], [0], [1], [0, 0, 1, 1], [], []>} : vector<80x8xbf16>, vector<8x8xbf16>, vector<80x8xf32> -> vector<80x8xf32>
    %80 = arith.addf %75, %79 : vector<80x8xf32>
    %c21_72 = arith.constant 21 : index
    %c0_73 = arith.constant 0 : index
    %81 = vector.load %arg9[%c21_72, %c0_73] : memref<102x8xbf16, #tpu.memory_space<vmem>>, vector<80x8xbf16>
    %c7 = arith.constant 7 : index
    %c0_74 = arith.constant 0 : index
    %c0_75 = arith.constant 0 : index
    %82 = vector.load %arg4[%c7, %c0_74, %c0_75] : memref<9x8x8xbf16, #tpu.memory_space<vmem>>, vector<1x8x8xbf16>
    %83 = vector.shape_cast %82 : vector<1x8x8xbf16> to vector<8x8xbf16>
    %cst_76 = arith.constant dense<0.000000e+00> : vector<80x8xf32>
    %84 = tpu.matmul %81, %83, %cst_76 {dimension_numbers = #tpu.dot_dimension_numbers<[1], [0], [0], [1], [0, 0, 1, 1], [], []>} : vector<80x8xbf16>, vector<8x8xbf16>, vector<80x8xf32> -> vector<80x8xf32>
    %85 = arith.addf %80, %84 : vector<80x8xf32>
    %c22 = arith.constant 22 : index
    %c0_77 = arith.constant 0 : index
    %86 = vector.load %arg9[%c22, %c0_77] : memref<102x8xbf16, #tpu.memory_space<vmem>>, vector<80x8xbf16>
    %c8 = arith.constant 8 : index
    %c0_78 = arith.constant 0 : index
    %c0_79 = arith.constant 0 : index
    %87 = vector.load %arg4[%c8, %c0_78, %c0_79] : memref<9x8x8xbf16, #tpu.memory_space<vmem>>, vector<1x8x8xbf16>
    %88 = vector.shape_cast %87 : vector<1x8x8xbf16> to vector<8x8xbf16>
    %cst_80 = arith.constant dense<0.000000e+00> : vector<80x8xf32>
    %89 = tpu.matmul %86, %88, %cst_80 {dimension_numbers = #tpu.dot_dimension_numbers<[1], [0], [0], [1], [0, 0, 1, 1], [], []>} : vector<80x8xbf16>, vector<8x8xbf16>, vector<80x8xf32> -> vector<80x8xf32>
    %90 = arith.addf %85, %89 : vector<80x8xf32>
    %c0_81 = arith.constant 0 : index
    %c0_82 = arith.constant 0 : index
    %91 = vector.load %arg5[%c0_81, %c0_82] : memref<1x8xf32, #tpu.memory_space<vmem>>, vector<1x8xf32>
    %92 = vector.broadcast %91 : vector<1x8xf32> to vector<80x8xf32>
    %93 = arith.addf %90, %92 : vector<80x8xf32>
    %c0_83 = arith.constant 0 : index
    %c0_84 = arith.constant 0 : index
    %c0_85 = arith.constant 0 : index
    %94 = vector.load %arg1[%c0_83, %c0_84, %c0_85] : memref<1x82x16xbf16, #tpu.memory_space<vmem>>, vector<1x72x16xbf16>
    %95 = vector.shape_cast %94 : vector<1x72x16xbf16> to vector<72x16xbf16>
    %c0_86 = arith.constant 0 : index
    %c0_87 = arith.constant 0 : index
    %96 = vector.load %arg6[%c0_86, %c0_87] : memref<16x8xbf16, #tpu.memory_space<vmem>>, vector<16x8xbf16>
    %cst_88 = arith.constant dense<0.000000e+00> : vector<72x8xf32>
    %97 = tpu.matmul %95, %96, %cst_88 {dimension_numbers = #tpu.dot_dimension_numbers<[1], [0], [0], [1], [0, 0, 1, 1], [], []>} : vector<72x16xbf16>, vector<16x8xbf16>, vector<72x8xf32> -> vector<72x8xf32>
    %c0_89 = arith.constant 0 : index
    %c0_90 = arith.constant 0 : index
    %98 = vector.load %arg7[%c0_89, %c0_90] : memref<1x8xf32, #tpu.memory_space<vmem>>, vector<1x8xf32>
    %99 = vector.broadcast %98 : vector<1x8xf32> to vector<72x8xf32>
    %100 = arith.addf %97, %99 : vector<72x8xf32>
    %101 = vector.extract_strided_slice %93 {offsets = [0, 0], sizes = [8, 8], strides = [1, 1]} : vector<80x8xf32> to vector<8x8xf32>
    %102 = vector.extract_strided_slice %100 {offsets = [0, 0], sizes = [8, 8], strides = [1, 1]} : vector<72x8xf32> to vector<8x8xf32>
    %103 = arith.addf %101, %102 : vector<8x8xf32>
    %cst_91 = arith.constant 0.000000e+00 : f32
    %104 = vector.broadcast %cst_91 : f32 to vector<8x8xf32>
    %105 = arith.maximumf %103, %104 : vector<8x8xf32>
    %c0_92 = arith.constant 0 : index
    %c0_93 = arith.constant 0 : index
    %c0_94 = arith.constant 0 : index
    %c0_95 = arith.constant 0 : index
    %106 = vector.load %arg8[%c0_92, %c0_93, %c0_94, %c0_95] : memref<1x8x8x8xf32, #tpu.memory_space<vmem>>, vector<1x1x8x8xf32>
    %107 = vector.shape_cast %106 : vector<1x1x8x8xf32> to vector<8x8xf32>
    %108 = vector.shape_cast %105 : vector<8x8xf32> to vector<1x1x8x8xf32>
    tpu.vector_store %arg8[%c0_92, %c0_93, %c0_94, %c0_95], %108 {strides = array<i32>} : memref<1x8x8x8xf32, #tpu.memory_space<vmem>>, vector<1x1x8x8xf32>,
    %109 = vector.extract_strided_slice %93 {offsets = [10, 0], sizes = [8, 8], strides = [1, 1]} : vector<80x8xf32> to vector<8x8xf32>
    %110 = vector.extract_strided_slice %100 {offsets = [9, 0], sizes = [8, 8], strides = [1, 1]} : vector<72x8xf32> to vector<8x8xf32>
    %111 = arith.addf %109, %110 : vector<8x8xf32>
    %cst_96 = arith.constant 0.000000e+00 : f32
    %112 = vector.broadcast %cst_96 : f32 to vector<8x8xf32>
    %113 = arith.maximumf %111, %112 : vector<8x8xf32>
    %c0_97 = arith.constant 0 : index
    %c1_98 = arith.constant 1 : index
    %c0_99 = arith.constant 0 : index
    %c0_100 = arith.constant 0 : index
    %114 = vector.load %arg8[%c0_97, %c1_98, %c0_99, %c0_100] : memref<1x8x8x8xf32, #tpu.memory_space<vmem>>, vector<1x1x8x8xf32>
    %115 = vector.shape_cast %114 : vector<1x1x8x8xf32> to vector<8x8xf32>
    %116 = vector.shape_cast %113 : vector<8x8xf32> to vector<1x1x8x8xf32>
    tpu.vector_store %arg8[%c0_97, %c1_98, %c0_99, %c0_100], %116 {strides = array<i32>} : memref<1x8x8x8xf32, #tpu.memory_space<vmem>>, vector<1x1x8x8xf32>,
    %117 = vector.extract_strided_slice %93 {offsets = [20, 0], sizes = [8, 8], strides = [1, 1]} : vector<80x8xf32> to vector<8x8xf32>
    %118 = vector.extract_strided_slice %100 {offsets = [18, 0], sizes = [8, 8], strides = [1, 1]} : vector<72x8xf32> to vector<8x8xf32>
    %119 = arith.addf %117, %118 : vector<8x8xf32>
    %cst_101 = arith.constant 0.000000e+00 : f32
    %120 = vector.broadcast %cst_101 : f32 to vector<8x8xf32>
    %121 = arith.maximumf %119, %120 : vector<8x8xf32>
    %c0_102 = arith.constant 0 : index
    %c2_103 = arith.constant 2 : index
    %c0_104 = arith.constant 0 : index
    %c0_105 = arith.constant 0 : index
    %122 = vector.load %arg8[%c0_102, %c2_103, %c0_104, %c0_105] : memref<1x8x8x8xf32, #tpu.memory_space<vmem>>, vector<1x1x8x8xf32>
    %123 = vector.shape_cast %122 : vector<1x1x8x8xf32> to vector<8x8xf32>
    %124 = vector.shape_cast %121 : vector<8x8xf32> to vector<1x1x8x8xf32>
    tpu.vector_store %arg8[%c0_102, %c2_103, %c0_104, %c0_105], %124 {strides = array<i32>} : memref<1x8x8x8xf32, #tpu.memory_space<vmem>>, vector<1x1x8x8xf32>,
    %125 = vector.extract_strided_slice %93 {offsets = [30, 0], sizes = [8, 8], strides = [1, 1]} : vector<80x8xf32> to vector<8x8xf32>
    %126 = vector.extract_strided_slice %100 {offsets = [27, 0], sizes = [8, 8], strides = [1, 1]} : vector<72x8xf32> to vector<8x8xf32>
    %127 = arith.addf %125, %126 : vector<8x8xf32>
    %cst_106 = arith.constant 0.000000e+00 : f32
    %128 = vector.broadcast %cst_106 : f32 to vector<8x8xf32>
    %129 = arith.maximumf %127, %128 : vector<8x8xf32>
    %c0_107 = arith.constant 0 : index
    %c3_108 = arith.constant 3 : index
    %c0_109 = arith.constant 0 : index
    %c0_110 = arith.constant 0 : index
    %130 = vector.load %arg8[%c0_107, %c3_108, %c0_109, %c0_110] : memref<1x8x8x8xf32, #tpu.memory_space<vmem>>, vector<1x1x8x8xf32>
    %131 = vector.shape_cast %130 : vector<1x1x8x8xf32> to vector<8x8xf32>
    %132 = vector.shape_cast %129 : vector<8x8xf32> to vector<1x1x8x8xf32>
    tpu.vector_store %arg8[%c0_107, %c3_108, %c0_109, %c0_110], %132 {strides = array<i32>} : memref<1x8x8x8xf32, #tpu.memory_space<vmem>>, vector<1x1x8x8xf32>,
    %133 = vector.extract_strided_slice %93 {offsets = [40, 0], sizes = [8, 8], strides = [1, 1]} : vector<80x8xf32> to vector<8x8xf32>
    %134 = vector.extract_strided_slice %100 {offsets = [36, 0], sizes = [8, 8], strides = [1, 1]} : vector<72x8xf32> to vector<8x8xf32>
    %135 = arith.addf %133, %134 : vector<8x8xf32>
    %cst_111 = arith.constant 0.000000e+00 : f32
    %136 = vector.broadcast %cst_111 : f32 to vector<8x8xf32>
    %137 = arith.maximumf %135, %136 : vector<8x8xf32>
    %c0_112 = arith.constant 0 : index
    %c4_113 = arith.constant 4 : index
    %c0_114 = arith.constant 0 : index
    %c0_115 = arith.constant 0 : index
    %138 = vector.load %arg8[%c0_112, %c4_113, %c0_114, %c0_115] : memref<1x8x8x8xf32, #tpu.memory_space<vmem>>, vector<1x1x8x8xf32>
    %139 = vector.shape_cast %138 : vector<1x1x8x8xf32> to vector<8x8xf32>
    %140 = vector.shape_cast %137 : vector<8x8xf32> to vector<1x1x8x8xf32>
    tpu.vector_store %arg8[%c0_112, %c4_113, %c0_114, %c0_115], %140 {strides = array<i32>} : memref<1x8x8x8xf32, #tpu.memory_space<vmem>>, vector<1x1x8x8xf32>,
    %141 = vector.extract_strided_slice %93 {offsets = [50, 0], sizes = [8, 8], strides = [1, 1]} : vector<80x8xf32> to vector<8x8xf32>
    %142 = vector.extract_strided_slice %100 {offsets = [45, 0], sizes = [8, 8], strides = [1, 1]} : vector<72x8xf32> to vector<8x8xf32>
    %143 = arith.addf %141, %142 : vector<8x8xf32>
    %cst_116 = arith.constant 0.000000e+00 : f32
    %144 = vector.broadcast %cst_116 : f32 to vector<8x8xf32>
    %145 = arith.maximumf %143, %144 : vector<8x8xf32>
    %c0_117 = arith.constant 0 : index
    %c5_118 = arith.constant 5 : index
    %c0_119 = arith.constant 0 : index
    %c0_120 = arith.constant 0 : index
    %146 = vector.load %arg8[%c0_117, %c5_118, %c0_119, %c0_120] : memref<1x8x8x8xf32, #tpu.memory_space<vmem>>, vector<1x1x8x8xf32>
    %147 = vector.shape_cast %146 : vector<1x1x8x8xf32> to vector<8x8xf32>
    %148 = vector.shape_cast %145 : vector<8x8xf32> to vector<1x1x8x8xf32>
    tpu.vector_store %arg8[%c0_117, %c5_118, %c0_119, %c0_120], %148 {strides = array<i32>} : memref<1x8x8x8xf32, #tpu.memory_space<vmem>>, vector<1x1x8x8xf32>,
    %149 = vector.extract_strided_slice %93 {offsets = [60, 0], sizes = [8, 8], strides = [1, 1]} : vector<80x8xf32> to vector<8x8xf32>
    %150 = vector.extract_strided_slice %100 {offsets = [54, 0], sizes = [8, 8], strides = [1, 1]} : vector<72x8xf32> to vector<8x8xf32>
    %151 = arith.addf %149, %150 : vector<8x8xf32>
    %cst_121 = arith.constant 0.000000e+00 : f32
    %152 = vector.broadcast %cst_121 : f32 to vector<8x8xf32>
    %153 = arith.maximumf %151, %152 : vector<8x8xf32>
    %c0_122 = arith.constant 0 : index
    %c6_123 = arith.constant 6 : index
    %c0_124 = arith.constant 0 : index
    %c0_125 = arith.constant 0 : index
    %154 = vector.load %arg8[%c0_122, %c6_123, %c0_124, %c0_125] : memref<1x8x8x8xf32, #tpu.memory_space<vmem>>, vector<1x1x8x8xf32>
    %155 = vector.shape_cast %154 : vector<1x1x8x8xf32> to vector<8x8xf32>
    %156 = vector.shape_cast %153 : vector<8x8xf32> to vector<1x1x8x8xf32>
    tpu.vector_store %arg8[%c0_122, %c6_123, %c0_124, %c0_125], %156 {strides = array<i32>} : memref<1x8x8x8xf32, #tpu.memory_space<vmem>>, vector<1x1x8x8xf32>,
    %157 = vector.extract_strided_slice %93 {offsets = [70, 0], sizes = [8, 8], strides = [1, 1]} : vector<80x8xf32> to vector<8x8xf32>
    %158 = vector.extract_strided_slice %100 {offsets = [63, 0], sizes = [8, 8], strides = [1, 1]} : vector<72x8xf32> to vector<8x8xf32>
    %159 = arith.addf %157, %158 : vector<8x8xf32>
    %cst_126 = arith.constant 0.000000e+00 : f32
    %160 = vector.broadcast %cst_126 : f32 to vector<8x8xf32>
    %161 = arith.maximumf %159, %160 : vector<8x8xf32>
    %c0_127 = arith.constant 0 : index
    %c7_128 = arith.constant 7 : index
    %c0_129 = arith.constant 0 : index
    %c0_130 = arith.constant 0 : index
    %162 = vector.load %arg8[%c0_127, %c7_128, %c0_129, %c0_130] : memref<1x8x8x8xf32, #tpu.memory_space<vmem>>, vector<1x1x8x8xf32>
    %163 = vector.shape_cast %162 : vector<1x1x8x8xf32> to vector<8x8xf32>
    %164 = vector.shape_cast %161 : vector<8x8xf32> to vector<1x1x8x8xf32>
    tpu.vector_store %arg8[%c0_127, %c7_128, %c0_129, %c0_130], %164 {strides = array<i32>} : memref<1x8x8x8xf32, #tpu.memory_space<vmem>>, vector<1x1x8x8xf32>,
    return
  }
  func.func @transform_0(%arg0: i32) -> (i32, i32, i32) {
    %c0_i32 = arith.constant 0 : i32
    %c0_i32_0 = arith.constant 0 : i32
    %c0_i32_1 = arith.constant 0 : i32
    return %arg0, %c0_i32, %c0_i32_0 : i32, i32, i32
  }
  func.func @transform_1(%arg0: i32) -> (i32, i32, i32) {
    %c0_i32 = arith.constant 0 : i32
    %c0_i32_0 = arith.constant 0 : i32
    %c0_i32_1 = arith.constant 0 : i32
    %c0_i32_2 = arith.constant 0 : i32
    return %c0_i32, %c0_i32_0, %c0_i32_1 : i32, i32, i32
  }
  func.func @transform_2(%arg0: i32) -> (i32, i32) {
    %c0_i32 = arith.constant 0 : i32
    %c0_i32_0 = arith.constant 0 : i32
    %c0_i32_1 = arith.constant 0 : i32
    return %c0_i32, %c0_i32_0 : i32, i32
  }
  func.func @transform_3(%arg0: i32) -> (i32, i32, i32) {
    %c0_i32 = arith.constant 0 : i32
    %c0_i32_0 = arith.constant 0 : i32
    %c0_i32_1 = arith.constant 0 : i32
    %c0_i32_2 = arith.constant 0 : i32
    return %c0_i32, %c0_i32_0, %c0_i32_1 : i32, i32, i32
  }
  func.func @transform_4(%arg0: i32) -> (i32, i32) {
    %c0_i32 = arith.constant 0 : i32
    %c0_i32_0 = arith.constant 0 : i32
    %c0_i32_1 = arith.constant 0 : i32
    return %c0_i32, %c0_i32_0 : i32, i32
  }
  func.func @transform_5(%arg0: i32) -> (i32, i32) {
    %c0_i32 = arith.constant 0 : i32
    %c0_i32_0 = arith.constant 0 : i32
    %c0_i32_1 = arith.constant 0 : i32
    return %c0_i32, %c0_i32_0 : i32, i32
  }
  func.func @transform_6(%arg0: i32) -> (i32, i32) {
    %c0_i32 = arith.constant 0 : i32
    %c0_i32_0 = arith.constant 0 : i32
    %c0_i32_1 = arith.constant 0 : i32
    return %c0_i32, %c0_i32_0 : i32, i32
  }
  func.func @transform_7(%arg0: i32) -> (i32, i32, i32, i32) {
    %c0_i32 = arith.constant 0 : i32
    %c0_i32_0 = arith.constant 0 : i32
    %c0_i32_1 = arith.constant 0 : i32
    %c0_i32_2 = arith.constant 0 : i32
    return %arg0, %c0_i32, %c0_i32_0, %c0_i32_1 : i32, i32, i32, i32
  }
}

</mosaic_0001>

<bundles_post_ra>
// kernel: basic_block_forward.1
= control target key start
LH: loop header
LB: loop body
LE: loop exit
PB: predicated region body
PF: predicated region fallthrough
CT: control target
= control target key end

     0   :  { %s3321_s24 = smov 0   ;;  %s4144_s0 = inlined_call_operand.vmem [shape: bf16[2,82,16], index: 0, kind: input, shape index: {}]   ;;  %s4145_s1 = inlined_call_operand.vmem [shape: bf16[4,16,8], index: 1, kind: input, shape index: {}]   ;;  %s4146_s2 = inlined_call_operand.vmem [shape: f32[1,8], index: 2, kind: input, shape index: {}]   ;;  %s4147_s3 = inlined_call_operand.vmem [shape: bf16[9,8,8], index: 3, kind: input, shape index: {}]   ;;  %s4148_s4 = inlined_call_operand.vmem [shape: f32[1,8], index: 4, kind: input, shape index: {}]   ;;  %s4149_s5 = inlined_call_operand.vmem [shape: bf16[16,8], index: 5, kind: input, shape index: {}]   ;;  %s4150_s6 = inlined_call_operand.vmem [shape: f32[1,8], index: 6, kind: input, shape index: {}]   ;;  %s4151_s7 = inlined_call_operand.vmem [shape: f32[2,8,8,8], index: 7, kind: output, shape index: {}]  }
   0x1 LB: > { %s2644_s25 = sadd.s32 4294967295, %s3276_s24   ;;  %p2648_p0 = scmp.ge.s32.totalorder %s3276_s24, 1  ;;  %s3276_s24 = sphi %s3321_s24, %s17_s24  }
   0x2   : > { %p237_p1 = scmp.lt.s32.totalorder %s3276_s24, 3 }
   0x4   : > { %p238_p2 = pnand %p2648_p0, %p237_p1 }
   0x5   : > { %p269_p3 = scmp.lt.s32.totalorder (!%p238_p2), %s2644_s25, 1 }
   0x6   : > { %241 = sbr.rel (%p238_p2) target bundleno = 698 (0x2ba), region = 48 }
   0xb   : > { %v3225_v0 = vld [vmem:[%s4145_s1] sm:$0xff]   ;;  %v3278_v1 = vmov 0.0   ;;  %v3226_v2 = vld [vmem:[%s4145_s1 + $0x8] sm:$0xff]   ;;  %vm4157_vm0 = vmmov 0   ;;  %s4274_s25 = smov (!%p269_p3, %s2644_s25), 1  ;;  %vm4152_vm1 = vcmask 130048  }
   0xc   : > { %2927 = vmatprep.subr.bf16.mxu1 %v3278_v1  ;;  %2905 = vmatprep.subr.bf16.mxu0 %v3278_v1  ;;  %s3213_s30 = smul.u32 44, %s4274_s25  ;;  %v3230_v3 = vld [vmem:[%s4145_s1 + $0x18] sm:$0xff]   ;;  %vm4154_vm2 = vsmask.f32 7424  ;;  %v3229_v13 = vld [vmem:[%s4145_s1 + $0x10] sm:$0xff]   ;;  %vm4153_vm3 = vcmask 1046528  }
   0xd   : > { %2928 = vmatpush3.bf16.msra.mxu1 %v3225_v0  ;;  %2929 = vmatprep.mubr.msk.bf16.mxu1 %vm4157_vm0, %v3278_v1  ;;  %vm4160_vm4 = vcmask 1043456   ;;  %vm4156_vm5 = vcmask 60416   ;;  %vm885_vm6 = vcmask 59392   ;;  %vm901_vm7 = vcmask 60417   ;;  %s2811_s20 = sshll.u32 %s4274_s25, 6 }
   0xe   : > { %2906 = vmatpush3.bf16.msra.mxu0 %v3226_v2  ;;  %2907 = vmatprep.mubr.msk.bf16.mxu0 %vm4157_vm0, %v3278_v1  ;;  %s3349_s10 = scalar_lea.vmem %s4144_s0, %s3213_s30  ;;  %vm902_vm8 = vsmask.f32 7942  ;;  %vm927_vm9 = vcmask 60418   ;;  %vm928_vm10 = vsmask.f32 7946  ;;  %vm4155_vm11 = vcmask 58368   ;;  %s4068_s23 = scalar_lea.vmem %s4151_s7, %s2811_s20 }
   0xf   : > { %2949 = vmatprep.subr.bf16.mxu0 %v3278_v1  ;;  %2971 = vmatprep.subr.bf16.mxu1 %v3278_v1  ;;  %v3227_v4 = vld [vmem:[%s3349_s10] sm:$0xff]   ;;  %v3228_v5 = vld [vmem:[%s3349_s10 + $0x8] sm:$0xff]   ;;  %v3231_v9 = vld [vmem:[%s3349_s10 + $0x10] sm:$0xff]   ;;  %vm908_vm12 = vsmask.f32 1280  ;;  %vm4159_vm15 = vcmask 1041408  }
  0x10   : > { %2930 = vmatmul.mubr.msk.bf16.vlgmr.msra.gmra.mxu1 %vm4152_vm1, %v3227_v4  ;;  %v322_v6 = vshrl.u32 %v3227_v4, 16  ;;  %v324_v7 = vshll.u32 %v3227_v4, 16  ;;  %v329_v8 = vshll.u32 %v3228_v5, 16  ;;  %v333_v14 = vshrl.u32 %v3228_v5, 16  ;;  %v3232_v19 = vld [vmem:[%s3349_s10 + $0x18] sm:$0xff]   ;;  %v3236_v39 = vld [vmem:[%s3349_s10 + $0xc] sm:$0xff]   ;;  %vm3501_vm13 = vmand %vm901_vm7, %vm902_vm8 }
  0x11   : > { %2972 = vmatpush3.bf16.msra.mxu1 %v3230_v3  ;;  %2933 = vmatprep.mubr.msk.bf16.mxu1 %vm4157_vm0, %v3278_v1  ;;  %v337_v15 = vshll.u32 %v3231_v9, 16  ;;  %v341_v21 = vshrl.u32 %v3231_v9, 16  ;;  %v345_v22 = vshll.u32 %v3232_v19, 16  ;;  %v288_v23 = vld [vmem:[%s3349_s10 + $0x20] sm:$0xf]  ;;  %v349_v29 = vshrl.u32 %v3232_v19, 16  ;;  %vm3510_vm14 = vmand %vm927_vm9, %vm928_vm10 }
  0x12   : > { %v326_v10 = vrot.slane %v324_v7, 1  ;;  %3015 = vmatprep.subr.bf16.mxu1 %v3278_v1  ;;  %v331_v11 = vrot.slane %v329_v8, 1  ;;  %v291_v24 = vld [vmem:[%s3349_s10 + $0x24] sm:$0x1]  ;;  %v545_v34 = vld [vmem:[%s3349_s10 + $0x8] sm:$0xf]  ;;  %v2665_v37 = vcombine.low %v288_v23, %v288_v23  ;;  %vm3518_vm8 = vmand %vm4155_vm11, %vm908_vm12 }
  0x13   : > { %v339_v18 = vrot.slane %v337_v15, 1  ;;  %v347_v26 = vrot.slane %v345_v22, 1  ;;  %v2658_v27 = vcombine.low %v288_v23, %v291_v24  ;;  %v544_v33 = vld [vmem:[%s3349_s10 + $0x4] sm:$0xf]  ;;  %v732_v44 = vrot.slane %v3236_v39, 1  ;;  %v3238_v50 = vld [vmem:[%s3349_s10 + $0x14] sm:$0xff]  }
  0x14   : > { %v327_v12 = vor.u32 %v326_v10, %v322_v6  ;;  %v335_v17 = vor.u32 %v333_v14, %v331_v11  ;;  %v723_v35 = vld [vmem:[%s3349_s10 + $0x4] sm:$0xe]  ;;  %v2674_v38 = vcombine.low %v544_v33, %v545_v34  ;;  %v590_v48 = vshll.u32 %v3236_v39, 16  ;;  %v3239_v58 = vld [vmem:[%s3349_s10 + $0x1c] sm:$0xff]  }
  0x15   : > { %v343_v25 = vor.u32 %v341_v21, %v339_v18  ;;  %v353_v30 = vshll.u32 %v2658_v27, 16  ;;  %v351_v31 = vor.u32 %v349_v29, %v347_v26  ;;  %v2687_v40 = vcombine.low %v723_v35, %v545_v34  ;;  %v3240_v3 = vld [vmem:[%s3349_s10 + $0x24] sm:$0x1f]  }
  0x16   : > { %v332_v16 = vsel %vm4154_vm2, %v327_v12, %v331_v11  ;;  %v340_v20 = vsel %vm4154_vm2, %v335_v17, %v339_v18  ;;  %v357_v41 = vshrl.u32 %v2658_v27, 16  ;;  %v585_v42 = vshll.u32 %v2674_v38, 16 }
  0x17   : > { %2908 = vmatmul.mubr.msk.bf16.vlgmr.msra.gmra.mxu0 %vm4152_vm1, %v332_v16  ;;  %v348_v28 = vsel %vm4154_vm2, %v343_v25, %v347_v26  ;;  %v355_v32 = vrot.slane %v353_v30, 1  ;;  %v731_v43 = vrot.slane %v2687_v40, 1  ;;  %v583_v46 = vshrl.u32 %v2674_v38, 16  ;;  %v2707_v16 = vld [vmem:[%s4147_s3 + $0x4] sm:$0xf] }
  0x18   : > { %2950 = vmatpush3.bf16.msra.mxu0 %v3229_v13  ;;  %2934 = vmatmul.mubr.msk.bf16.gmra.mxu1 %vm4152_vm1, %v3228_v5  ;;  %v587_v47 = vrot.slane %v585_v42, 1  ;;  %v592_v52 = vrot.slane %v590_v48, 1  ;;  %v734_v53 = vrot.slane %v3238_v50, 1  ;;  %v594_v55 = vshrl.u32 %v3236_v39, 16 }
  0x19   : > { %2911 = vmatprep.mubr.msk.bf16.mxu0 %vm4157_vm0, %v3278_v1  ;;  %2937 = vmatprep.mubr.msk.bf16.mxu1 %vm4157_vm0, %v3278_v1  ;;  %v356_v36 = vsel %vm4154_vm2, %v351_v31, %v355_v32  ;;  %v359_v45 = vor.u32 %v357_v41, %v355_v32  ;;  %v733_v49 = vsel %vm4153_vm3, %v731_v43, %v732_v44  ;;  %v598_v56 = vshll.u32 %v3238_v50, 16 }
  0x1a   : > { %2993 = vmatprep.subr.bf16.mxu0 %v3278_v1  ;;  %v588_v51 = vor.u32 %v587_v47, %v583_v46  ;;  %v735_v57 = vsel %vm4153_vm3, %v732_v44, %v734_v53  ;;  %v596_v59 = vor.u32 %v594_v55, %v592_v52  ;;  %v736_v61 = vrot.slane %v3239_v58, 1 }
  0x1b   : > { %v600_v60 = vrot.slane %v598_v56, 1  ;;  %v602_v63 = vshrl.u32 %v3238_v50, 16  ;;  %v606_v0 = vshll.u32 %v3239_v58, 16  ;;  %v738_v6 = vrot.slane %v3240_v3, 1 }
  0x1c   : > { %v593_v54 = vsel %vm4154_vm2, %v588_v51, %v592_v52  ;;  %v737_v2 = vsel %vm4153_vm3, %v734_v53, %v736_v61  ;;  %v610_v8 = vshrl.u32 %v3239_v58, 16  ;;  %v618_v14 = vshrl.u32 %v3240_v3, 16 }
  0x1d   : > { %v601_v62 = vsel %vm4154_vm2, %v596_v59, %v600_v60  ;;  %v604_v4 = vor.u32 %v602_v63, %v600_v60  ;;  %v608_v5 = vrot.slane %v606_v0, 1  ;;  %v739_v10 = vsel %vm4153_vm3, %v736_v61, %v738_v6 }
  0x1e   : > { %v1191_v17 = vsel %vm4160_vm4, %v2707_v16, 0  ;;  %v3280_v18 = vmov 0   ;;  %vm963_vm7 = vcmask 60419   ;;  %vm964_vm9 = vsmask.f32 7950 }
  0x1f   : > { %2912 = vmatmul.mubr.msk.bf16.gmra.mxu0 %vm4152_vm1, %v340_v20  ;;  %v609_v7 = vsel %vm4154_vm2, %v604_v4, %v608_v5  ;;  %v612_v11 = vor.u32 %v610_v8, %v608_v5  ;;  %874 = vst.msk [vmem:[#allocation2 + $0x4] sm:$0xf] %vm4156_vm5, %v3280_v18  ;;  %875 = vst.msk [vmem:[#allocation2 + $0x8] sm:$0xf] %vm4156_vm5, %v3280_v18  ;;  %vm934_vm10 = vsmask.f32 2304 }
  0x20   : > { %2938 = vmatmul.mubr.msk.bf16.gmra.mxu1 %vm4152_vm1, %v3231_v9  ;;  %2915 = vmatprep.mubr.msk.bf16.mxu0 %vm4157_vm0, %v3278_v1  ;;  %v614_v9 = vshll.u32 %v3240_v3, 16  ;;  %873 = vst.msk [vmem:[#allocation2] sm:$0xf] %vm4156_vm5, %v3280_v18  ;;  %876 = vst.msk [vmem:[#allocation2 + $0xc] sm:$0xf] %vm4156_vm5, %v3280_v18 }
  0x21   : > { %2941 = vmatprep.mubr.msk.bf16.mxu1 %vm4157_vm0, %v3278_v1  ;;  %877 = vst.msk [vmem:[#allocation2 + $0x10] sm:$0xf] %vm4156_vm5, %v3280_v18  ;;  %878 = vst.msk [vmem:[#allocation2 + $0x14] sm:$0xf] %vm4156_vm5, %v3280_v18  ;;  %vm941_vm12 = vsmask.f32 6416 }
  0x22   : > { %v616_v12 = vrot.slane %v614_v9, 1  ;;  %879 = vst.msk [vmem:[#allocation2 + $0x18] sm:$0xf] %vm4156_vm5, %v3280_v18  ;;  %880 = vst.msk [vmem:[#allocation2 + $0x1c] sm:$0xf] %vm4156_vm5, %v3280_v18 }
  0x23   : > { %881 = vst.msk [vmem:[#allocation2 + $0x20] sm:$0xf] %vm4156_vm5, %v3280_v18  ;;  %882 = vst.msk [vmem:[#allocation2 + $0x24] sm:$0xf] %vm4156_vm5, %v3280_v18 }
  0x24   : > { %v617_v13 = vsel %vm4154_vm2, %v612_v11, %v616_v12  ;;  %v620_v15 = vor.u32 %v618_v14, %v616_v12  ;;  %883 = vst.msk [vmem:[#allocation2 + $0x28] sm:$0xf] %vm4156_vm5, %v3280_v18  ;;  %884 = vst.msk [vmem:[#allocation2 + $0x2c] sm:$0xf] %vm4156_vm5, %v3280_v18  ;;  %vm979_vm2 = vcmask 1046532   ;;  %vm993_vm5 = vcmask 57344  }
  0x25   : > { %886 = vst.msk [vmem:[#allocation2 + $0x30] sm:$0x7] %vm885_vm6, %v3280_v18  ;;  %vm3541_vm3 = vmand %vm885_vm6, %vm934_vm10  ;;  %vm4181_vm6 = vcmask 60416  }
  0x27   : > { %2916 = vmatmul.mubr.msk.bf16.gmra.mxu0 %vm4152_vm1, %v348_v28 }
  0x28   : > { %2942 = vmatmul.mubr.msk.bf16.gmra.mxu1 %vm4152_vm1, %v3232_v19  ;;  %2919 = vmatprep.mubr.msk.bf16.mxu0 %vm4157_vm0, %v3278_v1  ;;  %v1097_v19 = vld [vmem:[%s4147_s3] sm:$0xf] }
  0x29   : > { %2945 = vmatprep.mubr.msk.bf16.mxu1 %vm4157_vm0, %v3278_v1  ;;  %v1277_v20 = vsel %vm4160_vm4, %v1097_v19, 0 }
  0x2f   : > { %2920 = vmatmul.mubr.msk.bf16.gmra.mxu0 %vm4152_vm1, %v356_v36 }
  0x30   : > { %2946 = vmatmul.mubr.msk.bf16.gmra.mxu1 %vm4152_vm1, %v2665_v37  ;;  %2923 = vmatprep.mubr.msk.bf16.mxu0 %vm4157_vm0, %v3278_v1 }
  0x31   : > { %2973 = vmatprep.mubr.msk.bf16.mxu1 %vm4157_vm0, %v3278_v1 }
  0x37   : > { %2924 = vmatmul.mubr.msk.bf16.gmra.mxu0 %vm4152_vm1, %v359_v45 }
  0x38   : > { %2974 = vmatmul.mubr.msk.bf16.vlgmr.msra.gmra.mxu1 %vm4152_vm1, %v733_v49  ;;  %2951 = vmatprep.mubr.msk.bf16.mxu0 %vm4157_vm0, %v3278_v1 }
  0x39   : > { %2977 = vmatprep.mubr.msk.bf16.mxu1 %vm4157_vm0, %v3278_v1  ;;  %3016 = vmatpush3.bf16.msra.mxu1 %v1277_v20 }
  0x3a   : > { %3059 = vmatprep.subr.bf16.mxu1 %v3278_v1 }
  0x3f   : > { %2952 = vmatmul.mubr.msk.bf16.vlgmr.msra.gmra.mxu0 %vm4152_vm1, %v593_v54 }
  0x40   : > { %2978 = vmatmul.mubr.msk.bf16.gmra.mxu1 %vm4152_vm1, %v735_v57  ;;  %2955 = vmatprep.mubr.msk.bf16.mxu0 %vm4157_vm0, %v3278_v1 }
  0x41   : > { %2981 = vmatprep.mubr.msk.bf16.mxu1 %vm4157_vm0, %v3278_v1  ;;  %2994 = vmatpush3.bf16.msra.mxu0 %v1191_v17 }
  0x42   : > { %3037 = vmatprep.subr.bf16.mxu0 %v3278_v1 }
  0x47   : > { %2956 = vmatmul.mubr.msk.bf16.gmra.mxu0 %vm4152_vm1, %v601_v62 }
  0x48   : > { %2982 = vmatmul.mubr.msk.bf16.gmra.mxu1 %vm4152_vm1, %v737_v2  ;;  %2959 = vmatprep.mubr.msk.bf16.mxu0 %vm4157_vm0, %v3278_v1 }
  0x49   : > { %2985 = vmatprep.mubr.msk.bf16.mxu1 %vm4157_vm0, %v3278_v1 }
  0x4f   : > { %2960 = vmatmul.mubr.msk.bf16.gmra.mxu0 %vm4152_vm1, %v609_v7 }
  0x50   : > { %2986 = vmatmul.mubr.msk.bf16.gmra.mxu1 %vm4152_vm1, %v739_v10  ;;  %2963 = vmatprep.mubr.msk.bf16.mxu0 %vm4157_vm0, %v3278_v1 }
  0x51   : > { %2989 = vmatprep.mubr.msk.bf16.mxu1 %vm4157_vm0, %v3278_v1 }
  0x57   : > { %2964 = vmatmul.mubr.msk.bf16.gmra.mxu0 %vm4152_vm1, %v617_v13 }
  0x58   : > { %2967 = vmatprep.mubr.msk.bf16.mxu0 %vm4157_vm0, %v3278_v1  ;;  %2990 = vmatmul.mubr.msk.bf16.gmra.mxu1 %vm4152_vm1, %v738_v6  ;;  %v3492_v6 = vld [vmem:[%s4146_s2] ss:$0 sm:$0xff] }
  0x59   : > { %3017 = vmatprep.mubr.msk.bf16.mxu1 %vm4157_vm0, %v3278_v1 }
  0x5f   : > { %2968 = vmatmul.mubr.msk.bf16.gmra.mxu0 %vm4152_vm1, %v620_v15  ;;  %vm919_vm1 = vcmask 1045508  }
  0x60   : > { %2995 = vmatprep.mubr.msk.bf16.mxu0 %vm4157_vm0, %v3278_v1  ;;  %vm3535_vm11 = vmor %vm4159_vm15, %vm919_vm1  ;;  %vm988_vm1 = vsmask.f32 7938  ;;  %vm994_vm0 = vsmask.f32 256 }
  0x61   : > { %vm3547_vm15 = vmand %vm963_vm7, %vm964_vm9  ;;  %vm4175_vm7 = vcmask 1042432  }
  0x62   : > { %vm3589_vm9 = vmor %vm4175_vm7, %vm979_vm2 }
  0xd0   : > { %v506_v21 = vpop.f32.mrf.mxu1 }
  0xd2   : > { %v2931_v22 = vpop.f32.mrf.mxu1 }
  0xd4   : > { %v509_v23 = vpop.f32.mrf.mxu1 }
  0xd6   : > { %v2932_v24 = vpop.f32.mrf.mxu1 }
  0xd7   : > { %v416_v25 = vpop.f32.mrf.mxu0 }
  0xd8   : > { %v514_v26 = vpop.f32.mrf.mxu1  ;;  %v507_v0 = vadd.f32 %v506_v21, %v416_v25 }
  0xd9   : > { %v2909_v27 = vpop.f32.mrf.mxu0 }
  0xda   : > { %v2935_v28 = vpop.f32.mrf.mxu1 }
  0xdb   : > { %v419_v29 = vpop.f32.mrf.mxu0 }
  0xdc   : > { %v3467_v30 = vpop.f32.mrf.mxu1  ;;  %v510_v8 = vadd.f32 %v509_v23, %v419_v29 }
  0xdd   : > { %v2910_v31 = vpop.f32.mrf.mxu0 }
  0xde   : > { %v2936_v32 = vpop.f32.mrf.mxu1 }
  0xdf   : > { %v424_v33 = vpop.f32.mrf.mxu0 }
  0xe0   : > { %v3469_v34 = vpop.f32.mrf.mxu1  ;;  %v515_v16 = vadd.f32 %v514_v26, %v424_v33 }
  0xe1   : > { %v2913_v35 = vpop.f32.mrf.mxu0 }
  0xe2   : > { %v2939_v36 = vpop.f32.mrf.mxu1 }
  0xe3   : > { %v427_v37 = vpop.f32.mrf.mxu0 }
  0xe4   : > { %v3471_v38 = vpop.f32.mrf.mxu1  ;;  %v518_v32 = vadd.f32 %v3467_v30, %v427_v37  ;;  %v930_v37 = vld [vmem:[#allocation2 + $0x8] sm:$0xc] }
  0xe5   : > { %v2914_v39 = vpop.f32.mrf.mxu0 }
  0xe6   : > { %v2940_v40 = vpop.f32.mrf.mxu1 }
  0xe7   : > { %v3473_v41 = vpop.f32.mrf.mxu0 }
  0xe8   : > { %v3475_v42 = vpop.f32.mrf.mxu1 }
  0xe9   : > { %v2917_v43 = vpop.f32.mrf.mxu0 }
  0xea   : > { %v2943_v44 = vpop.f32.mrf.mxu1 }
  0xeb   : > { %v3477_v45 = vpop.f32.mrf.mxu0 }
  0xec   : > { %v3479_v46 = vpop.f32.mrf.mxu1 }
  0xed   : > { %v2918_v47 = vpop.f32.mrf.mxu0 }
  0xee   : > { %v2944_v48 = vpop.f32.mrf.mxu1  ;;  %v904_v47 = vld [vmem:[#allocation2 + $0x4] sm:$0xe] }
  0xef   : > { %v3481_v49 = vpop.f32.mrf.mxu0 }
  0xf0   : > { %v3483_v50 = vpop.f32.mrf.mxu1 }
  0xf1   : > { %v2921_v51 = vpop.f32.mrf.mxu0 }
  0xf2   : > { %v2947_v52 = vpop.f32.mrf.mxu1 }
  0xf3   : > { %v3485_v53 = vpop.f32.mrf.mxu0 }
  0xf4   : > { %v541_v54 = vpop.f32.mrf.mxu1 }
  0xf5   : > { %v2922_v55 = vpop.f32.mrf.mxu0 }
  0xf6   : > { %v2948_v56 = vpop.f32.mrf.mxu1 }
  0xf7   : > { %v3487_v57 = vpop.f32.mrf.mxu0 }
  0xf8   : > { %v795_v58 = vpop.f32.mrf.mxu1 }
  0xf9   : > { %v2925_v59 = vpop.f32.mrf.mxu0 }
  0xfa   : > { %v2975_v60 = vpop.f32.mrf.mxu1 }
  0xfb   : > { %v451_v61 = vpop.f32.mrf.mxu0  ;;  %v910_v60 = vld [vmem:[#allocation2 + $0x8] sm:$0x3] }
  0xfc   : > { %v798_v62 = vpop.f32.mrf.mxu1 }
  0xfd   : > { %v2926_v63 = vpop.f32.mrf.mxu0 }
  0xfe   : > { %v2976_v2 = vpop.f32.mrf.mxu1 }
  0xff   : > { %v676_v3 = vpop.f32.mrf.mxu0 }
 0x100   : > { %v714_v4 = vadd.f32 %v676_v3, %v507_v0  ;;  %v803_v5 = vpop.f32.mrf.mxu1 }
 0x101   : > { %v2953_v7 = vpop.f32.mrf.mxu0 }
 0x102   : > { %v833_v9 = vadd.f32 %v795_v58, %v714_v4  ;;  %v2979_v10 = vpop.f32.mrf.mxu1  ;;  %v523_v58 = vadd.f32 %v3469_v34, %v3473_v41  ;;  %v526_v7 = vadd.f32 %v3471_v38, %v3477_v45  ;;  %v936_v45 = vld [vmem:[#allocation2 + $0xc] sm:$0x7] }
 0x103   : > { %v679_v11 = vpop.f32.mrf.mxu0  ;;  %v1035_v10 = vld [vmem:[#allocation2 + $0x1c] sm:$0xc] }
 0x104   : > { %v849_v12 = vadd.f32 %v3492_v6, %v833_v9  ;;  %v715_v13 = vadd.f32 %v679_v11, %v510_v8  ;;  %v806_v14 = vpop.f32.mrf.mxu1 }
 0x105   : > { %v2954_v15 = vpop.f32.mrf.mxu0 }
 0x106   : > { %v858_v17 = vmax.f32 %v849_v12, 0.0  ;;  %v834_v18 = vadd.f32 %v798_v62, %v715_v13  ;;  %v2980_v19 = vpop.f32.mrf.mxu1 }
 0x107   : > { %v684_v20 = vpop.f32.mrf.mxu0 }
 0x108   : > { %v2812_v21 = vpack.c.bf16 %v858_v17, %v858_v17  ;;  %v850_v22 = vadd.f32 %v3492_v6, %v834_v18  ;;  %v716_v24 = vadd.f32 %v684_v20, %v515_v16  ;;  %v3496_v25 = vpop.f32.mrf.mxu1  ;;  %v966_v18 = vld [vmem:[#allocation2 + $0xc] sm:$0x8] }
 0x109   : > { %v2957_v23 = vpop.f32.mrf.mxu0 }
 0x10a   : > { %v891_v27 = vshrl.u32 %v2812_v21, 16  ;;  %v894_v28 = vshll.u32 %v2812_v21, 16  ;;  %v859_v29 = vmax.f32 %v850_v22, 0.0  ;;  %v835_v31 = vadd.f32 %v803_v5, %v716_v24  ;;  %v2983_v26 = vpop.f32.mrf.mxu1 }
 0x10b   : > { %v687_v33 = vpop.f32.mrf.mxu0 }
 0x10c   : > { %v893_v35 = vrot.slane %v891_v27, 6  ;;  %v896_v36 = vrot.slane %v894_v28, 7  ;;  %v2813_v40 = vpack.c.bf16 %v859_v29, %v859_v29  ;;  %v851_v43 = vadd.f32 %v3492_v6, %v835_v31  ;;  %v3506_v44 = vpop.f32.mrf.mxu1 }
 0x10d   : > { %v717_v48 = vadd.f32 %v687_v33, %v518_v32  ;;  %v2958_v51 = vpop.f32.mrf.mxu0  ;;  %v531_v29 = vadd.f32 %v3475_v42, %v3481_v49  ;;  %v1087_v33 = vld [vmem:[#allocation2] sm:$0xf] }
 0x10e   : > { %v897_v52 = vor.u32 %v896_v36, %v893_v35  ;;  %v921_v54 = vrot.slane %v2813_v40, 6  ;;  %v860_v55 = vmax.f32 %v851_v43, 0.0  ;;  %v2984_v56 = vpop.f32.mrf.mxu1  ;;  %v2731_v35 = vld [vmem:[%s4147_s3 + $0xc] sm:$0xf] }
 0x10f   : > { %v836_v61 = vadd.f32 %v806_v14, %v717_v48  ;;  %v692_v62 = vpop.f32.mrf.mxu0 }
 0x110   : > { %v898_v63 = vrot.slane %v897_v52, 4  ;;  %v905_v0 = vsel %vm3501_vm13, %v897_v52, %v904_v47  ;;  %v931_v2 = vsel %vm3510_vm14, %v921_v54, %v930_v37  ;;  %v3526_v34 = vpop.f32.mrf.mxu1  ;;  %v2814_v41 = vpack.c.bf16 %v860_v55, %v860_v55 }
 0x111   : > { %906 = vst [vmem:[#allocation2 + $0x4] sm:$0xe] %v905_v0  ;;  %932 = vst [vmem:[#allocation2 + $0x8] sm:$0xc] %v931_v2  ;;  %v852_v3 = vadd.f32 %v3492_v6, %v836_v61  ;;  %v718_v4 = vadd.f32 %v692_v62, %v523_v58  ;;  %v2961_v5 = vpop.f32.mrf.mxu0  ;;  %v922_v9 = vrot.slane %v921_v54, 4  ;;  %v1538_v58 = vsel %vm4160_vm4, %v2731_v35, 0 }
 0x112   : > { %v911_v8 = vsel %vm3518_vm8, %v898_v63, %v910_v60  ;;  %v2987_v11 = vpop.f32.mrf.mxu1  ;;  %v923_v12 = vrot.slane %v2814_v41, 6  ;;  %v944_v13 = vshll.u32 %v2814_v41, 16  ;;  %v947_v14 = vshrl.u32 %v2814_v41, 16 }
 0x113   : > { %912 = vst [vmem:[#allocation2 + $0x8] sm:$0x3] %v911_v8  ;;  %v861_v15 = vmax.f32 %v852_v3, 0.0  ;;  %v695_v16 = vpop.f32.mrf.mxu0  ;;  %v837_v19 = vadd.f32 %v3496_v25, %v718_v4  ;;  %v534_v60 = vadd.f32 %v3479_v46, %v3485_v53  ;;  %v539_v41 = vadd.f32 %v3483_v50, %v3487_v57 }
 0x114   : > { %v719_v20 = vadd.f32 %v695_v16, %v526_v7  ;;  %v3552_v21 = vpop.f32.mrf.mxu1  ;;  %v924_v22 = vsel %vm3535_vm11, %v922_v9, %v923_v12  ;;  %v946_v24 = vrot.slane %v944_v13, 6  ;;  %v949_v23 = vrot.slane %v947_v14, 5  ;;  %vm3581_vm11 = vmor %vm934_vm10, %vm941_vm12  ;;  %v972_v13 = vld [vmem:[#allocation2 + $0x10] sm:$0xf]  ;;  %v990_v16 = vld [vmem:[#allocation2 + $0x14] sm:$0xf] }
 0x115   : > { %v2815_v27 = vpack.c.bf16 %v861_v15, %v861_v15  ;;  %v2962_v28 = vpop.f32.mrf.mxu0  ;;  %v853_v31 = vadd.f32 %v3492_v6, %v837_v19  ;;  %v937_v25 = vsel %vm3541_vm3, %v924_v22, %v936_v45  ;;  %vm4178_vm4 = vcmask 64512  }
 0x116   : > { %v838_v26 = vadd.f32 %v3506_v44, %v719_v20  ;;  %v2988_v32 = vpop.f32.mrf.mxu1  ;;  %v950_v36 = vor.u32 %v949_v23, %v946_v24  ;;  %v967_v40 = vsel %vm3547_vm15, %v946_v24, %v966_v18  ;;  %938 = vst [vmem:[#allocation2 + $0xc] sm:$0x7] %v937_v25  ;;  %vm4179_vm10 = vmmov 0   ;;  %v996_v23 = vld [vmem:[#allocation2 + $0x18] sm:$0x1] }
 0x117   : > { %v953_v43 = vshrl.u32 %v2815_v27, 16  ;;  %v956_v47 = vshll.u32 %v2815_v27, 16  ;;  %v700_v42 = vpop.f32.mrf.mxu0  ;;  %968 = vst [vmem:[#allocation2 + $0xc] sm:$0x8] %v967_v40  ;;  %v862_v49 = vmax.f32 %v853_v31, 0.0  ;;  %v2700_v5 = vrot.slane %v2815_v27, 9 }
 0x118   : > { %v854_v44 = vadd.f32 %v3492_v6, %v838_v26  ;;  %v720_v37 = vadd.f32 %v700_v42, %v531_v29  ;;  %v3568_v48 = vld [vmem:[#allocation2 + $0x4] sm:$0xf]  ;;  %v3570_v51 = vpop.f32.mrf.mxu1  ;;  %v951_v3 = vrot.slane %v950_v36, 4  ;;  %vm4180_vm12 = vsmask.f32 3328 }
 0x119   : > { %v955_v52 = vrot.slane %v953_v43, 5  ;;  %v958_v54 = vrot.slane %v956_v47, 6  ;;  %v2965_v55 = vpop.f32.mrf.mxu0  ;;  %v3573_v56 = vcombine.low %v1087_v33, %v3568_v48  ;;  %v2816_v61 = vpack.c.bf16 %v862_v49, %v862_v49  ;;  %vm3599_vm2 = vmand %vm4181_vm6, %vm4180_vm12  ;;  %v1038_v36 = vld [vmem:[#allocation2 + $0x20] sm:$0x7] }
 0x11a   : > { %v863_v62 = vmax.f32 %v854_v44, 0.0  ;;  %v839_v63 = vadd.f32 %v3526_v34, %v720_v37  ;;  %v2991_v2 = vpop.f32.mrf.mxu1  ;;  %vm4190_vm7 = vmmov %vm4180_vm12  ;;  %v1024_v55 = vld [vmem:[#allocation2 + $0x18] sm:$0xe]  ;;  %vm1072_vm12 = vcmask 1044484  }
 0x11b   : > { %v959_v4 = vor.u32 %v958_v54, %v955_v52  ;;  %v703_v53 = vpop.f32.mrf.mxu0  ;;  %3018 = vmatmul.mubr.msk.bf16.vlgmr.msra.gmra.mxu1 %vm4178_vm4, %v3573_v56  ;;  %v983_v34 = vrot.slane %v2816_v61, 5  ;;  %v1004_v7 = vshrl.u32 %v2816_v61, 16  ;;  %v1007_v8 = vshll.u32 %v2816_v61, 16  ;;  %vm4184_vm4 = vmmov %vm4181_vm6 }
 0x11c   : > { %v2817_v9 = vpack.c.bf16 %v863_v62, %v863_v62  ;;  %3021 = vmatprep.mubr.msk.bf16.mxu1 %vm4179_vm10, %v3278_v1  ;;  %v830_v50 = vpop.f32.mrf.mxu1  ;;  %3060 = vmatpush3.bf16.msra.mxu1 %v1538_v58  ;;  %v855_v11 = vadd.f32 %v3492_v6, %v839_v63  ;;  %v721_v14 = vadd.f32 %v703_v53, %v534_v60  ;;  %v1132_v45 = vshll.u32 %v3573_v56, 16  ;;  %vm3612_vm6 = vmand %vm4184_vm4, %vm988_vm1 }
 0x11d   : > { %v960_v12 = vsel %vm3581_vm11, %v951_v3, %v959_v4  ;;  %v2966_v15 = vpop.f32.mrf.mxu0  ;;  %3103 = vmatprep.subr.bf16.mxu1 %v3278_v1  ;;  %v984_v18 = vsel %vm3589_vm9, %v2700_v5, %v983_v34  ;;  %v985_v19 = vrot.slane %v983_v34, 4  ;;  %v1006_v20 = vrot.slane %v1004_v7, 4  ;;  %vm3620_vm11 = vmand %vm993_vm5, %vm994_vm0  ;;  %v1027_v3 = vld [vmem:[#allocation2 + $0x1c] sm:$0x3]  ;;  %v2724_v34 = vld [vmem:[%s4147_s3 + $0x8] sm:$0xf] }
 0x11e   : > { %v1009_v22 = vrot.slane %v1007_v8, 5  ;;  %v2992_v27 = vpop.f32.mrf.mxu1  ;;  %v1013_v28 = vshll.u32 %v2817_v9, 16  ;;  %v1017_v29 = vshrl.u32 %v2817_v9, 16  ;;  %v1036_v31 = vsel %vm3510_vm14, %v2817_v9, %v1035_v10  ;;  %v3635_v37 = vld [vmem:[#allocation2 + $0x8] sm:$0xff]  }
 0x11f   : > { %v864_v26 = vmax.f32 %v855_v11, 0.0  ;;  %v708_v25 = vpop.f32.mrf.mxu0  ;;  %1037 = vst [vmem:[#allocation2 + $0x1c] sm:$0xc] %v1036_v31  ;;  %v973_v35 = vsel %vm3599_vm2, %v960_v12, %v972_v13  ;;  %v840_v40 = vadd.f32 %v3552_v21, %v721_v14  ;;  %vm4189_vm1 = vsmask.f32 7440 }
 0x120   : > { %v1010_v33 = vor.u32 %v1009_v22, %v1006_v20  ;;  %v722_v43 = vadd.f32 %v708_v25, %v539_v41  ;;  %vm3629_vm14 = vmor %vm4190_vm7, %vm4189_vm1  ;;  %v1015_v47 = vrot.slane %v1013_v28, 5  ;;  %v1019_v42 = vrot.slane %v1017_v29, 4  ;;  %974 = vst [vmem:[#allocation2 + $0x10] sm:$0xf] %v973_v35  ;;  %v1062_v21 = vld [vmem:[#allocation2 + $0x20] sm:$0x8] }
 0x121   : > { %v2818_v49 = vpack.c.bf16 %v864_v26, %v864_v26  ;;  %v991_v44 = vsel %vm3612_vm6, %v984_v18, %v990_v16  ;;  %v2969_v52 = vpop.f32.mrf.mxu0  ;;  %v856_v58 = vadd.f32 %v3492_v6, %v840_v40  ;;  %v997_v61 = vsel %vm3620_vm11, %v985_v19, %v996_v23  ;;  %v1081_v13 = vld [vmem:[#allocation2 + $0x28] sm:$0xf]  ;;  %v1084_v15 = vld [vmem:[#allocation2 + $0x2c] sm:$0x1]  ;;  %v1065_v31 = vld [vmem:[#allocation2 + $0x24] sm:$0xf] }
 0x122   : > { %v1011_v54 = vrot.slane %v1010_v33, 4  ;;  %v841_v60 = vadd.f32 %v3570_v51, %v722_v43  ;;  %992 = vst [vmem:[#allocation2 + $0x14] sm:$0xf] %v991_v44  ;;  %v1020_v62 = vor.u32 %v1019_v42, %v1015_v47  ;;  %998 = vst [vmem:[#allocation2 + $0x18] sm:$0x1] %v997_v61  ;;  %vm1071_vm5 = vcmask 1040384  }
 0x123   : > { %v1039_v63 = vsel %vm3541_vm3, %v2818_v49, %v1038_v36  ;;  %v1046_v0 = vshll.u32 %v2818_v49, 16  ;;  %vm4193_vm9 = vcmask 64512   ;;  %v711_v2 = vpop.f32.mrf.mxu0  ;;  %v865_v51 = vmax.f32 %v856_v58, 0.0 }
 0x124   : > { %3022 = vmatmul.mubr.msk.bf16.gmra.mxu1 %vm4193_vm9, %v3635_v37  ;;  %v1016_v41 = vsel %vm3629_vm14, %v1011_v54, %v1015_v47  ;;  %1040 = vst [vmem:[#allocation2 + $0x20] sm:$0x7] %v1039_v63  ;;  %v857_v4 = vadd.f32 %v3492_v6, %v841_v60  ;;  %v1021_v38 = vrot.slane %v1020_v62, 4  ;;  %v1134_v53 = vrot.slane %v1132_v45, 1  ;;  %vm4200_vm1 = vmmov %vm4193_vm9  ;;  %v1470_v60 = vld [vmem:[#allocation2 + $0x4] sm:$0xe] }
 0x125   : > { %3025 = vmatprep.mubr.msk.bf16.mxu1 %vm4179_vm10, %v3278_v1  ;;  %v1025_v5 = vsel %vm3501_vm13, %v1016_v41, %v1024_v55  ;;  %v1063_v46 = vsel %vm3547_vm15, %v1046_v0, %v1062_v21  ;;  %v2970_v7 = vpop.f32.mrf.mxu0  ;;  %v2819_v6 = vpack.c.bf16 %v865_v51, %v865_v51  ;;  %v1137_v9 = vshll.u32 %v3635_v37, 16  ;;  %vm3663_vm13 = vmor %vm1071_vm5, %vm1072_vm12  ;;  %v3713_v21 = vld [vmem:[#allocation2 + $0x8] sm:$0xf]  ;;  %v2750_v41 = vld [vmem:[%s4147_s3 + $0x14] sm:$0xf] }
 0x126   : > { %1026 = vst [vmem:[#allocation2 + $0x18] sm:$0xe] %v1025_v5  ;;  %1064 = vst [vmem:[#allocation2 + $0x20] sm:$0x8] %v1063_v46  ;;  %v866_v8 = vmax.f32 %v857_v4, 0.0  ;;  %v1028_v10 = vsel %vm3518_vm8, %v1021_v38, %v1027_v3  ;;  %v1130_v39 = vshrl.u32 %v3573_v56, 16  ;;  %v3723_v61 = vcombine.low %v1470_v60, %v3713_v21 }
 0x127   : > { %vm1043_vm3 = vsmask.f32 4368  ;;  %1029 = vst [vmem:[#allocation2 + $0x1c] sm:$0x3] %v1028_v10  ;;  %v1048_v17 = vshrl.u32 %v2818_v49, 16  ;;  %v1053_v50 = vshrl.u32 %v2819_v6, 16  ;;  %vm4201_vm7 = vmmov %vm4200_vm1 }
 0x128   : > { %v2820_v11 = vpack.c.bf16 %v866_v8, %v866_v8  ;;  %vm4196_vm15 = vcmask 1043456   ;;  %v1135_v16 = vor.u32 %v1134_v53, %v1130_v39  ;;  %v1139_v59 = vrot.slane %v1137_v9, 1  ;;  %vm3672_vm8 = vmor %vm994_vm0, %vm1043_vm3  ;;  %v3715_v58 = vld [vmem:[#allocation2 + $0xc] sm:$0xff]   ;;  %v1352_v10 = vld [vmem:[#allocation2] sm:$0xe] }
 0x129   : > { %v1385_v14 = vsel %vm4196_vm15, %v2724_v34, 0  ;;  %v3668_v45 = vld [vmem:[#allocation2 + $0x10] sm:$0xff]   ;;  %v1055_v18 = vrot.slane %v1053_v50, 7  ;;  %v1056_v56 = vshll.u32 %v2819_v6, 16  ;;  %v2706_v19 = vrot.slane %v2819_v6, 11  ;;  %vm4204_vm14 = vmmov %vm4200_vm1 }
 0x12a   : > { %v1076_v20 = vrot.slane %v2820_v11, 7  ;;  %vm4199_vm4 = vsmask.f32 7424  ;;  %v1145_v27 = vshll.u32 %v3668_v45, 16  ;;  %v2704_v28 = vrot.slane %v1048_v17, 11  ;;  %vm4207_vm9 = vmmov %vm4200_vm1 }
 0x12b   : > { %v1140_v23 = vsel %vm4199_vm4, %v1135_v16, %v1139_v59  ;;  %v1058_v29 = vor.u32 %v1056_v56, %v1055_v18  ;;  %v1141_v35 = vshrl.u32 %v3635_v37, 16  ;;  %vm4202_vm0 = vmmov %vm4199_vm4  ;;  %v1149_v57 = vshrl.u32 %v3668_v45, 16  ;;  %v2757_v60 = vld [vmem:[%s4147_s3 + $0x18] sm:$0xf] }
 0x12c   : > { %3026 = vmatmul.mubr.msk.bf16.gmra.mxu1 %vm4200_vm1, %v3668_v45  ;;  %v1077_v26 = vsel %vm3663_vm13, %v2706_v19, %v1076_v20  ;;  %v1078_v25 = vrot.slane %v1076_v20, 4  ;;  %2996 = vmatmul.mubr.msk.bf16.vlgmr.msra.gmra.mxu0 %vm4201_vm7, %v1140_v23  ;;  %v1147_v36 = vrot.slane %v1145_v27, 1  ;;  %v1512_v0 = vrot.slane %v3715_v58, 1  ;;  %vm4208_vm12 = vmmov %vm4202_vm0 }
 0x12d   : > { %3029 = vmatprep.mubr.msk.bf16.mxu1 %vm4179_vm10, %v3278_v1  ;;  %v1082_v33 = vsel %vm3612_vm6, %v1077_v26, %v1081_v13  ;;  %3038 = vmatpush3.bf16.msra.mxu0 %v1385_v14  ;;  %v1059_v40 = vsel %vm3672_vm8, %v2704_v28, %v1058_v29  ;;  %v1143_v30 = vor.u32 %v1141_v35, %v1139_v59  ;;  %vm4203_vm6 = vmmov %vm4200_vm1  ;;  %v1511_v3 = vrot.slane %v3723_v61, 1  ;;  %v3737_v5 = vld [vmem:[#allocation2 + $0x14] sm:$0xff]   ;;  %v2743_v13 = vld [vmem:[%s4147_s3 + $0x10] sm:$0xf] }
 0x12e   : > { %2999 = vmatprep.mubr.msk.bf16.mxu0 %vm4179_vm10, %v3278_v1  ;;  %1083 = vst [vmem:[#allocation2 + $0x28] sm:$0xf] %v1082_v33  ;;  %v1085_v43 = vsel %vm3620_vm11, %v1078_v25, %v1084_v15  ;;  %3081 = vmatprep.subr.bf16.mxu0 %v3278_v1  ;;  %v1066_v24 = vsel %vm3599_vm2, %v1059_v40, %v1065_v31  ;;  %v3697_v47 = vld [vmem:[#allocation2 + $0x18] sm:$0xff]   ;;  %vm4205_vm2 = vmmov %vm4202_vm0  ;;  %vm4209_vm3 = vcmask 1046528   ;;  %v1514_v7 = vrot.slane %v3737_v5, 1 }
 0x12f   : > { %1086 = vst [vmem:[#allocation2 + $0x2c] sm:$0x1] %v1085_v43  ;;  %1067 = vst [vmem:[#allocation2 + $0x24] sm:$0xf] %v1066_v24  ;;  %v1148_v42 = vsel %vm4202_vm0, %v1143_v30, %v1147_v36  ;;  %v1153_v49 = vshll.u32 %v3697_v47, 16  ;;  %v1151_v44 = vor.u32 %v1149_v57, %v1147_v36  ;;  %v1157_v62 = vshrl.u32 %v3697_v47, 16 }
 0x130   : > { %vm4206_vm11 = vmmov %vm4200_vm1  ;;  %v1513_v38 = vsel %vm4209_vm3, %v1511_v3, %v1512_v0  ;;  %v3751_v39 = vld [vmem:[#allocation2 + $0x1c] sm:$0xff]   ;;  %v2725_v50 = vcombine.low %v1352_v10, %v3568_v48  ;;  %v1359_v12 = vrot.slane %v3635_v37, 1  ;;  %v1361_v37 = vrot.slane %v3668_v45, 1  ;;  %v1784_v28 = vld [vmem:[#allocation2 + $0x4] sm:$0xc] }
 0x131   : > { %v1155_v32 = vrot.slane %v1153_v49, 1  ;;  %vm4210_vm13 = vmmov %vm4196_vm15  ;;  %v1516_v11 = vrot.slane %v3751_v39, 1  ;;  %v1363_v23 = vrot.slane %v3697_v47, 1  ;;  %v2751_v29 = vcombine.low %v1784_v28, %v3713_v21  ;;  %v2769_v25 = vld [vmem:[%s4147_s3 + $0x1c] sm:$0xf] }
 0x132   : > { %v1818_v46 = vsel %vm4210_vm13, %v2750_v41, 0  ;;  %vm4211_vm15 = vmmov %vm4200_vm1  ;;  %v1358_v14 = vrot.slane %v2725_v50, 1  ;;  %v1792_v31 = vrot.slane %v3715_v58, 2  ;;  %v1794_v43 = vrot.slane %v3737_v5, 2 }
 0x133   : > { %v1156_v54 = vsel %vm4205_vm2, %v1151_v44, %v1155_v32  ;;  %v1159_v2 = vor.u32 %v1157_v62, %v1155_v32  ;;  %vm4212_vm8 = vmmov %vm4200_vm1  ;;  %v1791_v33 = vrot.slane %v2751_v29, 2  ;;  %v1639_v30 = vshrl.u32 %v3715_v58, 16 }
 0x134   : > { %3030 = vmatmul.mubr.msk.bf16.gmra.mxu1 %vm4203_vm6, %v3697_v47  ;;  %3000 = vmatmul.mubr.msk.bf16.gmra.mxu0 %vm4204_vm14, %v1148_v42  ;;  %vm4213_vm4 = vmmov %vm4209_vm3  ;;  %v1642_v47 = vshll.u32 %v3715_v58, 16  ;;  %v1631_v42 = vshrl.u32 %v3723_v61, 16  ;;  %v1634_v49 = vshll.u32 %v3723_v61, 16  ;;  %v1796_v21 = vrot.slane %v3751_v39, 2 }
 0x135   : > { %3033 = vmatprep.mubr.msk.bf16.mxu1 %vm4179_vm10, %v3278_v1  ;;  %3003 = vmatprep.mubr.msk.bf16.mxu0 %vm4179_vm10, %v3278_v1  ;;  %v3734_v4 = vld [vmem:[#allocation2 + $0x28] ss:$0 sps:$4 sm:$0x11]   ;;  %v1515_v9 = vsel %vm4213_vm4, %v1512_v0, %v1514_v7  ;;  %vm4214_vm1 = vmmov %vm4202_vm0  ;;  %v1641_v44 = vrot.slane %v1639_v30, 1  ;;  %v1648_v61 = vshrl.u32 %v3737_v5, 16  ;;  %v1651_v62 = vshll.u32 %v3737_v5, 16 }
 0x136   : > { %v3709_v52 = vld [vmem:[#allocation2 + $0x20] sm:$0xff]   ;;  %v1169_v34 = vshll.u32 %v3734_v4, 16  ;;  %vm4215_vm7 = vmmov %vm4203_vm6  ;;  %v3253_v19 = vld [vmem:[#allocation2 + $0x2c] ss:$0 sps:$4 sm:$0x11]   ;;  %v1367_v24 = vrot.slane %v3734_v4, 1 }
 0x137   : > { %v1161_v55 = vshll.u32 %v3709_v52, 16  ;;  %v1165_v53 = vshrl.u32 %v3709_v52, 16  ;;  %vm4216_vm0 = vmmov %vm4203_vm6  ;;  %v3768_v59 = vld [vmem:[#allocation2 + $0x24] sm:$0xff]   ;;  %v1520_v22 = vrot.slane %v3253_v19, 1  ;;  %v1365_v26 = vrot.slane %v3709_v52, 1  ;;  %v3868_v19 = vld [vmem:[#allocation2 + $0x18] sm:$0xff]  }
 0x138   : > { %v1171_v8 = vrot.slane %v1169_v34, 1  ;;  %vm4217_vm6 = vmmov %vm4210_vm13  ;;  %v1518_v48 = vrot.slane %v3768_v59, 1  ;;  %v1650_v3 = vrot.slane %v1648_v61, 1  ;;  %v1798_v4 = vrot.slane %v3768_v59, 2 }
 0x139   : > { %v1163_v63 = vrot.slane %v1161_v55, 1  ;;  %v1699_v15 = vsel %vm4217_vm6, %v2743_v13, 0  ;;  %vm4218_vm14 = vmmov %vm4209_vm3  ;;  %v2132_v36 = vsel %vm4217_vm6, %v2769_v25, 0  ;;  %v1636_v55 = vrot.slane %v1634_v49, 2 }
 0x13a   : > { %v1517_v16 = vsel %vm4218_vm14, %v1514_v7, %v1516_v11  ;;  %vm4219_vm2 = vmmov %vm4209_vm3  ;;  %v1657_v5 = vshrl.u32 %v3751_v39, 16  ;;  %v3255_v7 = vld [vmem:[#allocation2 + $0x2c] ss:$0 sps:$4 sm:$0x33]   ;;  %v2081_v28 = vshrl.u32 %v3868_v19, 16  ;;  %v2084_v29 = vshll.u32 %v3868_v19, 16 }
 0x13b   : > { %v1164_v51 = vsel %vm4208_vm12, %v1159_v2, %v1163_v63  ;;  %v1167_v6 = vor.u32 %v1165_v53, %v1163_v63  ;;  %v1360_v18 = vsel %vm4219_vm2, %v1358_v14, %v1359_v12  ;;  %vm4222_vm12 = vmmov %vm4219_vm2  ;;  %v3846_v53 = vld [vmem:[#allocation2 + $0xc] sm:$0xf]  ;;  %v1800_v50 = vrot.slane %v3255_v7, 2 }
 0x13c   : > { %3034 = vmatmul.mubr.msk.bf16.gmra.mxu1 %vm4206_vm11, %v3709_v52  ;;  %3004 = vmatmul.mubr.msk.bf16.gmra.mxu0 %vm4207_vm9, %v1156_v54  ;;  %vm4220_vm11 = vmmov %vm4216_vm0  ;;  %v1519_v56 = vsel %vm4222_vm12, %v1516_v11, %v1518_v48  ;;  %v1644_v52 = vrot.slane %v1642_v47, 2  ;;  %v1633_v54 = vrot.slane %v1631_v42, 1  ;;  %v1666_v14 = vshrl.u32 %v3768_v59, 16 }
 0x13d   : > { %3061 = vmatprep.mubr.msk.bf16.mxu1 %vm4179_vm10, %v3278_v1  ;;  %3007 = vmatprep.mubr.msk.bf16.mxu0 %vm4179_vm10, %v3278_v1  ;;  %v1172_v17 = vsel %vm4214_vm1, %v1167_v6, %v1171_v8  ;;  %vm4221_vm9 = vmmov %vm4216_vm0  ;;  %v3849_v6 = vld [vmem:[#allocation2 + $0x10] sm:$0xff]   ;;  %v1678_v25 = vshll.u32 %v3255_v7, 16 }
 0x13e   : > { %vm4223_vm3 = vmmov %vm4219_vm2  ;;  %v1645_v58 = vor.u32 %v1644_v52, %v1641_v44  ;;  %v1637_v63 = vor.u32 %v1636_v55, %v1633_v54  ;;  %v2072_v11 = vshrl.u32 %v3849_v6, 16 }
 0x13f   : > { %v1362_v20 = vsel %vm4223_vm3, %v1359_v12, %v1361_v37  ;;  %vm4224_vm13 = vmmov %vm4216_vm0  ;;  %v2075_v12 = vshll.u32 %v3849_v6, 16  ;;  %v1680_v42 = vrot.slane %v1678_v25, 2 }
 0x140   : > { %vm4227_vm4 = vmmov %vm4219_vm2 }
 0x141   : > { %v1364_v27 = vsel %vm4227_vm4, %v1361_v37, %v1363_v23  ;;  %vm4228_vm1 = vmmov %vm4216_vm0  ;;  %v2074_v37 = vrot.slane %v2072_v11, 2 }
 0x142   : > { %vm4230_vm14 = vmmov %vm4219_vm2 }
 0x143   : > { %v1366_v40 = vsel %vm4230_vm14, %v1363_v23, %v1365_v26  ;;  %vm4234_vm12 = vmmov %vm4228_vm1 }
 0x144   : > { %3062 = vmatmul.mubr.msk.bf16.vlgmr.msra.gmra.mxu1 %vm4211_vm15, %v1513_v38  ;;  %3008 = vmatmul.mubr.msk.bf16.gmra.mxu0 %vm4212_vm8, %v1164_v51  ;;  %vm4225_vm15 = vmmov %vm4216_vm0  ;;  %v1653_v51 = vrot.slane %v1651_v62, 2 }
 0x145   : > { %3065 = vmatprep.mubr.msk.bf16.mxu1 %vm4179_vm10, %v3278_v1  ;;  %3011 = vmatprep.mubr.msk.bf16.mxu0 %vm4179_vm10, %v3278_v1  ;;  %vm4226_vm8 = vmmov %vm4219_vm2 }
 0x146   : > { %3104 = vmatpush3.bf16.msra.mxu1 %v1818_v46  ;;  %v1521_v45 = vsel %vm4226_vm8, %v1518_v48, %v1520_v22  ;;  %vm4231_vm2 = vmmov %vm4228_vm1  ;;  %v1654_v38 = vor.u32 %v1653_v51, %v1650_v3  ;;  %v1660_v46 = vshll.u32 %v3751_v39, 16  ;;  %v1668_v22 = vrot.slane %v1666_v14, 1 }
 0x147   : > { %3147 = vmatprep.subr.bf16.mxu1 %v3278_v1  ;;  %vm4237_vm8 = vmmov %vm4228_vm1 }
 0x148   : > { %vm4238_vm4 = vmmov %vm4228_vm1  ;;  %v1662_v10 = vrot.slane %v1660_v46, 2 }
 0x149   : > { %vm4241_vm14 = vmmov %vm4228_vm1 }
 0x14c   : > { %3066 = vmatmul.mubr.msk.bf16.gmra.mxu1 %vm4215_vm7, %v1515_v9  ;;  %3012 = vmatmul.mubr.msk.bf16.gmra.mxu0 %vm4216_vm0, %v1172_v17  ;;  %vm4229_vm7 = vmmov %vm4216_vm0  ;;  %vm1790_vm0 = vcmask 1045504   ;;  %v1659_v9 = vrot.slane %v1657_v5, 1  ;;  %v1903_v17 = vld [vmem:[#allocation2 + $0x8] sm:$0xc] }
 0x14d   : > { %3069 = vmatprep.mubr.msk.bf16.mxu1 %vm4179_vm10, %v3278_v1  ;;  %3039 = vmatprep.mubr.msk.bf16.mxu0 %vm4179_vm10, %v3278_v1  ;;  %v1793_v35 = vsel %vm1790_vm0, %v1791_v33, %v1792_v31  ;;  %v1795_v57 = vsel %vm1790_vm0, %v1792_v31, %v1794_v43  ;;  %v1797_v2 = vsel %vm1790_vm0, %v1794_v43, %v1796_v21  ;;  %v2086_v43 = vrot.slane %v2084_v29, 3 }
 0x14e   : > { %v1799_v34 = vsel %vm1790_vm0, %v1796_v21, %v1798_v4  ;;  %v3857_v39 = vcombine.low %v1903_v17, %v3846_v53  ;;  %v1663_v13 = vor.u32 %v1662_v10, %v1659_v9  ;;  %v1801_v48 = vsel %vm1790_vm0, %v1798_v4, %v1800_v50  ;;  %v3895_v21 = vld [vmem:[#allocation2 + $0x28] sm:$0xff]  }
 0x14f   : > { %v2099_v61 = vshrl.u32 %v3895_v21, 16  ;;  %v2102_v62 = vshll.u32 %v3895_v21, 16  ;;  %v1951_v14 = vrot.slane %v3895_v21, 2 }
 0x151   : > { %v2101_v51 = vrot.slane %v2099_v61, 2  ;;  %v2104_v4 = vrot.slane %v2102_v62, 3 }
 0x153   : > { %v2105_v46 = vor.u32 %v2104_v4, %v2101_v51 }
 0x154   : > { %3070 = vmatmul.mubr.msk.bf16.gmra.mxu1 %vm4220_vm11, %v1517_v16  ;;  %3040 = vmatmul.mubr.msk.bf16.vlgmr.msra.gmra.mxu0 %vm4221_vm9, %v1360_v18  ;;  %vm4232_vm11 = vmmov %vm4228_vm1  ;;  %v2064_v16 = vshrl.u32 %v3857_v39, 16  ;;  %v2067_v18 = vshll.u32 %v3857_v39, 16 }
 0x155   : > { %3073 = vmatprep.mubr.msk.bf16.mxu1 %vm4179_vm10, %v3278_v1  ;;  %3082 = vmatpush3.bf16.msra.mxu0 %v1699_v15  ;;  %vm4233_vm9 = vmmov %vm4223_vm3  ;;  %v1669_v15 = vshll.u32 %v3768_v59, 16 }
 0x156   : > { %3043 = vmatprep.mubr.msk.bf16.mxu0 %vm4179_vm10, %v3278_v1  ;;  %3125 = vmatprep.subr.bf16.mxu0 %v3278_v1  ;;  %v1368_v32 = vsel %vm4233_vm9, %v1365_v26, %v1367_v24  ;;  %vm4235_vm3 = vmmov %vm4228_vm1  ;;  %v2066_v59 = vrot.slane %v2064_v16, 2  ;;  %v1675_v26 = vshrl.u32 %v3255_v7, 16  ;;  %v3883_v24 = vld [vmem:[#allocation2 + $0x20] sm:$0xff]  }
 0x157   : > { %v1671_v23 = vrot.slane %v1669_v15, 2  ;;  %vm4243_vm9 = vmmov %vm4228_vm1  ;;  %v1949_v11 = vrot.slane %v3883_v24, 2  ;;  %v3264_v15 = vld [vmem:[%s3349_s10] sm:$0xff]   ;;  %v2229_v29 = vrot.slane %v3883_v24, 3 }
 0x158   : > { %v1677_v47 = vrot.slane %v1675_v26, 1 }
 0x159   : > { %v1672_v31 = vor.u32 %v1671_v23, %v1668_v22  ;;  %v1952_v16 = vsel %vm1790_vm0, %v1949_v11, %v1951_v14  ;;  %v2225_v23 = vrot.slane %v3849_v6, 3 }
 0x15a   : > { %v1681_v44 = vor.u32 %v1680_v42, %v1677_v47 }
 0x15c   : > { %3074 = vmatmul.mubr.msk.bf16.gmra.mxu1 %vm4224_vm13, %v1519_v56  ;;  %3044 = vmatmul.mubr.msk.bf16.gmra.mxu0 %vm4225_vm15, %v1362_v20  ;;  %vm1629_vm13 = vsmask.f32 6400  ;;  %vm4236_vm15 = vmmov %vm4217_vm6  ;;  %v2077_v56 = vrot.slane %v2075_v12, 3 }
 0x15d   : > { %3077 = vmatprep.mubr.msk.bf16.mxu1 %vm4179_vm10, %v3278_v1  ;;  %3047 = vmatprep.mubr.msk.bf16.mxu0 %vm4179_vm10, %v3278_v1  ;;  %v1971_v0 = vsel %vm4236_vm15, %v2757_v60, 0  ;;  %v1646_v41 = vsel %vm1629_vm13, %v1637_v63, %v1645_v58  ;;  %v1655_v8 = vsel %vm1629_vm13, %v1645_v58, %v1654_v38  ;;  %v1664_v20 = vsel %vm1629_vm13, %v1654_v38, %v1663_v13  ;;  %vm4240_vm6 = vmmov %vm4228_vm1  ;;  %v3913_v38 = vld [vmem:[#allocation2 + $0x30] ss:$0 sps:$4 sm:$0x77]  }
 0x15e   : > { %v1673_v30 = vsel %vm1629_vm13, %v1663_v13, %v1672_v31  ;;  %v1682_v58 = vsel %vm1629_vm13, %v1672_v31, %v1681_v44  ;;  %v1945_v63 = vrot.slane %v3849_v6, 2  ;;  %vm4246_vm13 = vmmov %vm4236_vm15  ;;  %v2111_v7 = vshll.u32 %v3913_v38, 16  ;;  %v3269_v31 = vld [vmem:[%s3349_s10 + $0x20] ss:$0 sps:$4 sm:$0xff]  }
 0x15f   : > { %vm4247_vm15 = vmmov %vm4228_vm1 }
 0x160   : > { %v2113_v17 = vrot.slane %v2111_v7, 3 }
 0x164   : > { %3078 = vmatmul.mubr.msk.bf16.gmra.mxu1 %vm4228_vm1, %v1521_v45  ;;  %3048 = vmatmul.mubr.msk.bf16.gmra.mxu0 %vm4229_vm7, %v1364_v27  ;;  %vm4239_vm7 = vmmov %vm4228_vm1  ;;  %v2069_v45 = vrot.slane %v2067_v18, 3  ;;  %v2078_v27 = vor.u32 %v2077_v56, %v2074_v37  ;;  %v3263_v18 = vld [vmem:[#allocation2 + $0x30] ss:$0 sps:$4 sm:$0x33]   ;;  %v3266_v37 = vld [vmem:[%s3349_s10 + $0x8] sm:$0xff]  }
 0x165   : > { %3105 = vmatprep.mubr.msk.bf16.mxu1 %vm4179_vm10, %v3278_v1  ;;  %3051 = vmatprep.mubr.msk.bf16.mxu0 %vm4179_vm10, %v3278_v1 }
 0x166   : > { %v2070_v33 = vor.u32 %v2069_v45, %v2066_v59  ;;  %v3267_v59 = vld [vmem:[%s3349_s10 + $0x10] sm:$0xff]  }
 0x16c   : > { %3106 = vmatmul.mubr.msk.bf16.vlgmr.msra.gmra.mxu1 %vm4231_vm2, %v1793_v35  ;;  %3052 = vmatmul.mubr.msk.bf16.gmra.mxu0 %vm4232_vm11, %v1366_v40  ;;  %vm2062_vm2 = vsmask.f32 5376  ;;  %v3259_v35 = vld [vmem:[%s4149_s5] sm:$0xff]   ;;  %v2083_v40 = vrot.slane %v2081_v28, 2  ;;  %vm4242_vm11 = vmmov %vm4228_vm1  ;;  %v3268_v28 = vld [vmem:[%s3349_s10 + $0x18] sm:$0xff]  }
 0x16d   : > { %3109 = vmatprep.mubr.msk.bf16.mxu1 %vm4179_vm10, %v3278_v1  ;;  %3055 = vmatprep.mubr.msk.bf16.mxu0 %vm4179_vm10, %v3278_v1 }
 0x16e   : > { %3148 = vmatpush3.bf16.msra.mxu1 %v2132_v36  ;;  %v2079_v36 = vsel %vm2062_vm2, %v2070_v33, %v2078_v27  ;;  %v2087_v49 = vor.u32 %v2086_v43, %v2083_v40  ;;  %v2231_v33 = vrot.slane %v3895_v21, 3 }
 0x16f   : > { %3191 = vmatprep.subr.bf16.mxu1 %v3278_v1 }
 0x170   : > { %v2088_v52 = vsel %vm2062_vm2, %v2078_v27, %v2087_v49 }
 0x174   : > { %3110 = vmatmul.mubr.msk.bf16.gmra.mxu1 %vm4234_vm12, %v1795_v57  ;;  %3056 = vmatmul.mubr.msk.bf16.gmra.mxu0 %vm4235_vm3, %v1368_v32  ;;  %v2090_v57 = vshrl.u32 %v3883_v24, 16  ;;  %v2093_v32 = vshll.u32 %v3883_v24, 16  ;;  %vm4244_vm12 = vmmov %vm4228_vm1 }
 0x175   : > { %3113 = vmatprep.mubr.msk.bf16.mxu1 %vm4179_vm10, %v3278_v1  ;;  %3083 = vmatprep.mubr.msk.bf16.mxu0 %vm4179_vm10, %v3278_v1  ;;  %vm4245_vm3 = vmmov %vm4228_vm1 }
 0x176   : > { %v2092_v54 = vrot.slane %v2090_v57, 2  ;;  %v2095_v55 = vrot.slane %v2093_v32, 3 }
 0x178   : > { %v2096_v60 = vor.u32 %v2095_v55, %v2092_v54 }
 0x17a   : > { %v2097_v3 = vsel %vm2062_vm2, %v2087_v49, %v2096_v60  ;;  %v2106_v9 = vsel %vm2062_vm2, %v2096_v60, %v2105_v46 }
 0x17c   : > { %3114 = vmatmul.mubr.msk.bf16.gmra.mxu1 %vm4237_vm8, %v1797_v2  ;;  %3084 = vmatmul.mubr.msk.bf16.vlgmr.msra.gmra.mxu0 %vm4238_vm4, %v1646_v41  ;;  %v1944_v2 = vrot.slane %v3857_v39, 2  ;;  %vm4248_vm8 = vmmov %vm4228_vm1 }
 0x17d   : > { %3117 = vmatprep.mubr.msk.bf16.mxu1 %vm4179_vm10, %v3278_v1  ;;  %3126 = vmatpush3.bf16.msra.mxu0 %v1971_v0  ;;  %v2776_v0 = vld [vmem:[%s4147_s3 + $0x20] sm:$0xf]  ;;  %vm4249_vm4 = vmmov %vm4228_vm1 }
 0x17e   : > { %3087 = vmatprep.mubr.msk.bf16.mxu0 %vm4179_vm10, %v3278_v1  ;;  %3169 = vmatprep.subr.bf16.mxu0 %v3278_v1  ;;  %v2251_v41 = vsel %vm4246_vm13, %v2776_v0, 0  ;;  %v1946_v5 = vsel %vm1790_vm0, %v1944_v2, %v1945_v63  ;;  %vm4257_vm13 = vmmov %vm4228_vm1 }
 0x184   : > { %3118 = vmatmul.mubr.msk.bf16.gmra.mxu1 %vm4228_vm1, %v1799_v34  ;;  %3088 = vmatmul.mubr.msk.bf16.gmra.mxu0 %vm4239_vm7, %v1655_v8  ;;  %v2108_v34 = vshrl.u32 %v3913_v38, 16  ;;  %v1947_v8 = vrot.slane %v3868_v19, 2  ;;  %vm4250_vm7 = vmmov %vm4228_vm1 }
 0x185   : > { %3121 = vmatprep.mubr.msk.bf16.mxu1 %vm4179_vm10, %v3278_v1  ;;  %3091 = vmatprep.mubr.msk.bf16.mxu0 %vm4179_vm10, %v3278_v1 }
 0x186   : > { %v2110_v10 = vrot.slane %v2108_v34, 2  ;;  %v1948_v39 = vsel %vm1790_vm0, %v1945_v63, %v1947_v8  ;;  %v1950_v13 = vsel %vm1790_vm0, %v1947_v8, %v1949_v11 }
 0x188   : > { %v2114_v50 = vor.u32 %v2113_v17, %v2110_v10 }
 0x18a   : > { %v2115_v12 = vsel %vm2062_vm2, %v2105_v46, %v2114_v50  ;;  %vm4253_vm2 = vmmov %vm4228_vm1 }
 0x18c   : > { %3122 = vmatmul.mubr.msk.bf16.gmra.mxu1 %vm4240_vm6, %v1801_v48  ;;  %3092 = vmatmul.mubr.msk.bf16.gmra.mxu0 %vm4241_vm14, %v1664_v20  ;;  %vm4251_vm6 = vmmov %vm4228_vm1  ;;  %vm4252_vm14 = vcmask 130048   ;;  %v1953_v48 = vrot.slane %v3263_v18, 2  ;;  %v2217_v20 = vld [vmem:[#allocation2 + $0x8] sm:$0x8] }
 0x18d   : > { %3149 = vmatprep.mubr.msk.bf16.mxu1 %vm4179_vm10, %v3278_v1  ;;  %3095 = vmatprep.mubr.msk.bf16.mxu0 %vm4179_vm10, %v3278_v1  ;;  %v2777_v22 = vcombine.low %v2217_v20, %v3846_v53  ;;  %v2227_v53 = vrot.slane %v3868_v19, 3 }
 0x18e   : > { %v1954_v56 = vsel %vm1790_vm0, %v1951_v14, %v1953_v48 }
 0x18f   : > { %v2224_v45 = vrot.slane %v2777_v22, 3 }
 0x194   : > { %3150 = vmatmul.mubr.msk.bf16.vlgmr.msra.gmra.mxu1 %vm4242_vm11, %v2079_v36  ;;  %3096 = vmatmul.mubr.msk.bf16.gmra.mxu0 %vm4243_vm9, %v1673_v30  ;;  %vm4254_vm11 = vmmov %vm4252_vm14  ;;  %v2233_v30 = vrot.slane %v3913_v38, 3 }
 0x195   : > { %3153 = vmatprep.mubr.msk.bf16.mxu1 %vm4179_vm10, %v3278_v1  ;;  %3099 = vmatprep.mubr.msk.bf16.mxu0 %vm4179_vm10, %v3278_v1  ;;  %vm4255_vm9 = vmmov %vm4228_vm1 }
 0x196   : > { %3192 = vmatpush3.bf16.msra.mxu1 %v3259_v35 }
 0x19c   : > { %3154 = vmatmul.mubr.msk.bf16.gmra.mxu1 %vm4244_vm12, %v2088_v52  ;;  %3100 = vmatmul.mubr.msk.bf16.gmra.mxu0 %vm4245_vm3, %v1682_v58  ;;  %vm2223_vm12 = vcmask 1044480   ;;  %vm4256_vm3 = vmmov %vm4254_vm11 }
 0x19d   : > { %3157 = vmatprep.mubr.msk.bf16.mxu1 %vm4179_vm10, %v3278_v1  ;;  %3127 = vmatprep.mubr.msk.bf16.mxu0 %vm4179_vm10, %v3278_v1  ;;  %v2226_v27 = vsel %vm2223_vm12, %v2224_v45, %v2225_v23  ;;  %v2228_v6 = vsel %vm2223_vm12, %v2225_v23, %v2227_v53  ;;  %v2230_v26 = vsel %vm2223_vm12, %v2227_v53, %v2229_v29 }
 0x19e   : > { %v2232_v40 = vsel %vm2223_vm12, %v2229_v29, %v2231_v33  ;;  %v2234_v49 = vsel %vm2223_vm12, %v2231_v33, %v2233_v30 }
 0x1a4   : > { %3158 = vmatmul.mubr.msk.bf16.gmra.mxu1 %vm4247_vm15, %v2097_v3  ;;  %3128 = vmatmul.mubr.msk.bf16.vlgmr.msra.gmra.mxu0 %vm4248_vm8, %v1946_v5  ;;  %vm4258_vm15 = vmmov %vm4256_vm3 }
 0x1a5   : > { %3161 = vmatprep.mubr.msk.bf16.mxu1 %vm4179_vm10, %v3278_v1  ;;  %3170 = vmatpush3.bf16.msra.mxu0 %v2251_v41  ;;  %vm4259_vm8 = vmmov %vm4228_vm1 }
 0x1a6   : > { %3131 = vmatprep.mubr.msk.bf16.mxu0 %vm4179_vm10, %v3278_v1 }
 0x1ac   : > { %3162 = vmatmul.mubr.msk.bf16.gmra.mxu1 %vm4249_vm4, %v2106_v9  ;;  %3132 = vmatmul.mubr.msk.bf16.gmra.mxu0 %vm4228_vm1, %v1948_v39  ;;  %vm4260_vm4 = vmmov %vm4256_vm3 }
 0x1ad   : > { %3165 = vmatprep.mubr.msk.bf16.mxu1 %vm4179_vm10, %v3278_v1  ;;  %3135 = vmatprep.mubr.msk.bf16.mxu0 %vm4179_vm10, %v3278_v1 }
 0x1b4   : > { %3166 = vmatmul.mubr.msk.bf16.gmra.mxu1 %vm4250_vm7, %v2115_v12  ;;  %3136 = vmatmul.mubr.msk.bf16.gmra.mxu0 %vm4251_vm6, %v1950_v13  ;;  %vm4261_vm7 = vmmov %vm4228_vm1 }
 0x1b5   : > { %3193 = vmatprep.mubr.msk.bf16.mxu1 %vm4179_vm10, %v3278_v1  ;;  %3139 = vmatprep.mubr.msk.bf16.mxu0 %vm4179_vm10, %v3278_v1  ;;  %vm4262_vm6 = vmmov %vm4228_vm1 }
 0x1bc   : > { %3194 = vmatmul.mubr.msk.bf16.vlgmr.msra.gmra.mxu1 %vm4252_vm14, %v3264_v15  ;;  %3140 = vmatmul.mubr.msk.bf16.gmra.mxu0 %vm4253_vm2, %v1952_v16  ;;  %vm2503_vm14 = vcmask 64514   ;;  %vm2519_vm2 = vcmask 64516  }
 0x1bd   : > { %3197 = vmatprep.mubr.msk.bf16.mxu1 %vm4179_vm10, %v3278_v1  ;;  %3143 = vmatprep.mubr.msk.bf16.mxu0 %vm4179_vm10, %v3278_v1 }
 0x1c4   : > { %3198 = vmatmul.mubr.msk.bf16.gmra.mxu1 %vm4254_vm11, %v3266_v37  ;;  %3144 = vmatmul.mubr.msk.bf16.gmra.mxu0 %vm4255_vm9, %v1954_v56  ;;  %vm4264_vm11 = vcmask 1041408   ;;  %vm2534_vm9 = vcmask 64518  }
 0x1c5   : > { %3201 = vmatprep.mubr.msk.bf16.mxu1 %vm4179_vm10, %v3278_v1  ;;  %3171 = vmatprep.mubr.msk.bf16.mxu0 %vm4179_vm10, %v3278_v1 }
 0x1cc   : > { %3202 = vmatmul.mubr.msk.bf16.gmra.mxu1 %vm4256_vm3, %v3267_v59  ;;  %3172 = vmatmul.mubr.msk.bf16.vlgmr.msra.gmra.mxu0 %vm4257_vm13, %v2226_v27  ;;  %vm4266_vm3 = vcmask 1042432   ;;  %vm4267_vm13 = vcmask 60416  }
 0x1cd   : > { %3205 = vmatprep.mubr.msk.bf16.mxu1 %vm4179_vm10, %v3278_v1  ;;  %3175 = vmatprep.mubr.msk.bf16.mxu0 %vm4179_vm10, %v3278_v1 }
 0x1d4   : > { %3206 = vmatmul.mubr.msk.bf16.gmra.mxu1 %vm4258_vm15, %v3268_v28  ;;  %3176 = vmatmul.mubr.msk.bf16.gmra.mxu0 %vm4259_vm8, %v2228_v6  ;;  %vm2536_vm15 = vcmask 62464   ;;  %vm4268_vm8 = vcmask 1043456  }
 0x1d5   : > { %3209 = vmatprep.mubr.msk.bf16.mxu1 %vm4179_vm10, %v3278_v1  ;;  %3179 = vmatprep.mubr.msk.bf16.mxu0 %vm4179_vm10, %v3278_v1 }
 0x1db   : > { %v1313_v25 = vpop.f32.mrf.mxu1 }
 0x1dc   : > { %3210 = vmatmul.mubr.msk.bf16.gmra.mxu1 %vm4260_vm4, %v3269_v31  ;;  %3180 = vmatmul.mubr.msk.bf16.gmra.mxu0 %vm4228_vm1, %v2230_v26  ;;  %vm4269_vm4 = vmmov %vm4228_vm1 }
 0x1dd   : > { %v3019_v19 = vpop.f32.mrf.mxu1  ;;  %3183 = vmatprep.mubr.msk.bf16.mxu0 %vm4179_vm10, %v3278_v1 }
 0x1df   : > { %v1316_v35 = vpop.f32.mrf.mxu1 }
 0x1e1   : > { %v3020_v36 = vpop.f32.mrf.mxu1 }
 0x1e4   : > { %v1321_v43 = vpop.f32.mrf.mxu1  ;;  %3184 = vmatmul.mubr.msk.bf16.gmra.mxu0 %vm4261_vm7, %v2232_v40 }
 0x1e5   : > { %3187 = vmatprep.mubr.msk.bf16.mxu0 %vm4179_vm10, %v3278_v1  ;;  %vm4263_vm10 = vmmov %vm4228_vm1 }
 0x1e6   : > { %v3023_v24 = vpop.f32.mrf.mxu1  ;;  %vm4272_vm1 = vmmov %vm4267_vm13 }
 0x1e8   : > { %v1324_v47 = vpop.f32.mrf.mxu1 }
 0x1ea   : > { %v3024_v42 = vpop.f32.mrf.mxu1 }
 0x1ec   : > { %v1329_v57 = vpop.f32.mrf.mxu1  ;;  %v1227_v32 = vpop.f32.mrf.mxu0  ;;  %3188 = vmatmul.mubr.msk.bf16.gmra.mxu0 %vm4262_vm6, %v2234_v49 }
 0x1ed   : > { %v1314_v44 = vadd.f32 %v1313_v25, %v1227_v32 }
 0x1ee   : > { %v3027_v52 = vpop.f32.mrf.mxu1  ;;  %v2997_v54 = vpop.f32.mrf.mxu0 }
 0x1f0   : > { %v1332_v55 = vpop.f32.mrf.mxu1  ;;  %v1230_v21 = vpop.f32.mrf.mxu0 }
 0x1f1   : > { %v1317_v58 = vadd.f32 %v1316_v35, %v1230_v21 }
 0x1f2   : > { %v3028_v60 = vpop.f32.mrf.mxu1  ;;  %v2998_v61 = vpop.f32.mrf.mxu0 }
 0x1f4   : > { %v1337_v62 = vpop.f32.mrf.mxu1  ;;  %v1235_v1 = vpop.f32.mrf.mxu0 }
 0x1f5   : > { %v1322_v63 = vadd.f32 %v1321_v43, %v1235_v1 }
 0x1f6   : > { %v3031_v0 = vpop.f32.mrf.mxu1  ;;  %v3001_v2 = vpop.f32.mrf.mxu0 }
 0x1f8   : > { %v1340_v41 = vpop.f32.mrf.mxu1  ;;  %v1238_v3 = vpop.f32.mrf.mxu0 }
 0x1f9   : > { %v1325_v51 = vadd.f32 %v1324_v47, %v1238_v3 }
 0x1fa   : > { %v3032_v4 = vpop.f32.mrf.mxu1  ;;  %v3002_v38 = vpop.f32.mrf.mxu0 }
 0x1fc   : > { %v1345_v5 = vpop.f32.mrf.mxu1  ;;  %v1243_v46 = vpop.f32.mrf.mxu0 }
 0x1fd   : > { %v1330_v34 = vadd.f32 %v1329_v57, %v1243_v46 }
 0x1fe   : > { %v3035_v7 = vpop.f32.mrf.mxu1  ;;  %v3005_v8 = vpop.f32.mrf.mxu0 }
 0x200   : > { %v1348_v9 = vpop.f32.mrf.mxu1  ;;  %v1246_v10 = vpop.f32.mrf.mxu0 }
 0x201   : > { %v1333_v17 = vadd.f32 %v1332_v55, %v1246_v10 }
 0x202   : > { %v3036_v39 = vpop.f32.mrf.mxu1  ;;  %v3006_v50 = vpop.f32.mrf.mxu0 }
 0x204   : > { %v1574_v11 = vpop.f32.mrf.mxu1  ;;  %v1251_v12 = vpop.f32.mrf.mxu0 }
 0x205   : > { %v1338_v13 = vadd.f32 %v1337_v62, %v1251_v12 }
 0x206   : > { %v3063_v14 = vpop.f32.mrf.mxu1  ;;  %v3009_v15 = vpop.f32.mrf.mxu0 }
 0x208   : > { %v1577_v16 = vpop.f32.mrf.mxu1  ;;  %v1254_v18 = vpop.f32.mrf.mxu0 }
 0x209   : > { %v1341_v48 = vadd.f32 %v1340_v41, %v1254_v18 }
 0x20a   : > { %v3064_v37 = vpop.f32.mrf.mxu1  ;;  %v3010_v56 = vpop.f32.mrf.mxu0 }
 0x20c   : > { %v1582_v20 = vpop.f32.mrf.mxu1  ;;  %v1259_v22 = vpop.f32.mrf.mxu0 }
 0x20d   : > { %v1346_v23 = vadd.f32 %v1345_v5, %v1259_v22 }
 0x20e   : > { %v3067_v59 = vpop.f32.mrf.mxu1  ;;  %v3013_v45 = vpop.f32.mrf.mxu0 }
 0x210   : > { %v1585_v27 = vpop.f32.mrf.mxu1  ;;  %v1262_v53 = vpop.f32.mrf.mxu0 }
 0x211   : > { %v1349_v28 = vadd.f32 %v1348_v9, %v1262_v53 }
 0x212   : > { %v3068_v6 = vpop.f32.mrf.mxu1  ;;  %v3014_v29 = vpop.f32.mrf.mxu0 }
 0x214   : > { %v1590_v31 = vpop.f32.mrf.mxu1  ;;  %v1421_v26 = vpop.f32.mrf.mxu0 }
 0x215   : > { %v1460_v25 = vadd.f32 %v1421_v26, %v1314_v44 }
 0x216   : > { %v3071_v19 = vpop.f32.mrf.mxu1  ;;  %v3041_v33 = vpop.f32.mrf.mxu0 }
 0x217   : > { %v1613_v36 = vadd.f32 %v1574_v11, %v1460_v25 }
 0x218   : > { %v1593_v35 = vpop.f32.mrf.mxu1  ;;  %v1424_v40 = vpop.f32.mrf.mxu0 }
 0x219   : > { %v1461_v43 = vadd.f32 %v1424_v40, %v1317_v58 }
 0x21a   : > { %v3072_v24 = vpop.f32.mrf.mxu1  ;;  %v3042_v30 = vpop.f32.mrf.mxu0 }
 0x21b   : > { %v1614_v42 = vadd.f32 %v1577_v16, %v1461_v43 }
 0x21c   : > { %v1598_v47 = vpop.f32.mrf.mxu1  ;;  %v1429_v49 = vpop.f32.mrf.mxu0 }
 0x21d   : > { %v1462_v57 = vadd.f32 %v1429_v49, %v1322_v63 }
 0x21e   : > { %v3075_v32 = vpop.f32.mrf.mxu1  ;;  %v3045_v52 = vpop.f32.mrf.mxu0 }
 0x21f   : > { %v1615_v55 = vadd.f32 %v1582_v20, %v1462_v57 }
 0x220   : > { %v1601_v54 = vpop.f32.mrf.mxu1  ;;  %v1432_v21 = vpop.f32.mrf.mxu0 }
 0x221   : > { %v1463_v60 = vadd.f32 %v1432_v21, %v1325_v51 }
 0x222   : > { %v3076_v61 = vpop.f32.mrf.mxu1  ;;  %v3046_v44 = vpop.f32.mrf.mxu0 }
 0x223   : > { %v1616_v1 = vadd.f32 %v1585_v27, %v1463_v60 }
 0x224   : > { %v1606_v62 = vpop.f32.mrf.mxu1  ;;  %v1437_v0 = vpop.f32.mrf.mxu0 }
 0x225   : > { %v1464_v2 = vadd.f32 %v1437_v0, %v1330_v34 }
 0x226   : > { %v3079_v41 = vpop.f32.mrf.mxu1  ;;  %v3049_v58 = vpop.f32.mrf.mxu0 }
 0x227   : > { %v1617_v4 = vadd.f32 %v1590_v31, %v1464_v2 }
 0x228   : > { %v1609_v3 = vpop.f32.mrf.mxu1  ;;  %v1440_v38 = vpop.f32.mrf.mxu0 }
 0x229   : > { %v1465_v5 = vadd.f32 %v1440_v38, %v1333_v17 }
 0x22a   : > { %v3080_v46 = vpop.f32.mrf.mxu1  ;;  %v3050_v63 = vpop.f32.mrf.mxu0 }
 0x22b   : > { %v1618_v8 = vadd.f32 %v1593_v35, %v1465_v5 }
 0x22c   : > { %v1854_v7 = vpop.f32.mrf.mxu1  ;;  %v1445_v9 = vpop.f32.mrf.mxu0 }
 0x22d   : > { %v1466_v10 = vadd.f32 %v1445_v9, %v1338_v13 }
 0x22e   : > { %v3107_v39 = vpop.f32.mrf.mxu1  ;;  %v3053_v51 = vpop.f32.mrf.mxu0 }
 0x22f   : > { %v1619_v11 = vadd.f32 %v1598_v47, %v1466_v10 }
 0x230   : > { %v1857_v50 = vpop.f32.mrf.mxu1  ;;  %v1448_v12 = vpop.f32.mrf.mxu0 }
 0x231   : > { %v1467_v14 = vadd.f32 %v1448_v12, %v1341_v48 }
 0x232   : > { %v3108_v15 = vpop.f32.mrf.mxu1  ;;  %v3054_v34 = vpop.f32.mrf.mxu0 }
 0x233   : > { %v1620_v18 = vadd.f32 %v1601_v54, %v1467_v14 }
 0x234   : > { %v1862_v16 = vpop.f32.mrf.mxu1  ;;  %v1453_v37 = vpop.f32.mrf.mxu0 }
 0x235   : > { %v1468_v56 = vadd.f32 %v1453_v37, %v1346_v23 }
 0x236   : > { %v3111_v20 = vpop.f32.mrf.mxu1  ;;  %v3057_v17 = vpop.f32.mrf.mxu0 }
 0x237   : > { %v1621_v59 = vadd.f32 %v1606_v62, %v1468_v56 }
 0x238   : > { %v1865_v22 = vpop.f32.mrf.mxu1  ;;  %v1456_v45 = vpop.f32.mrf.mxu0 }
 0x239   : > { %v1469_v27 = vadd.f32 %v1456_v45, %v1349_v28 }
 0x23a   : > { %v3112_v53 = vpop.f32.mrf.mxu1  ;;  %v3058_v13 = vpop.f32.mrf.mxu0 }
 0x23b   : > { %v1622_v29 = vadd.f32 %v1609_v3, %v1469_v27 }
 0x23c   : > { %v1870_v6 = vpop.f32.mrf.mxu1  ;;  %v1735_v31 = vpop.f32.mrf.mxu0 }
 0x23d   : > { %v1774_v26 = vadd.f32 %v1735_v31, %v1613_v36 }
 0x23e   : > { %v3115_v25 = vpop.f32.mrf.mxu1  ;;  %v3085_v48 = vpop.f32.mrf.mxu0 }
 0x23f   : > { %v3993_v33 = vadd.f32 %v1854_v7, %v1774_v26 }
 0x240   : > { %v1873_v19 = vpop.f32.mrf.mxu1  ;;  %v1738_v35 = vpop.f32.mrf.mxu0 }
 0x241   : > { %v1775_v40 = vadd.f32 %v1738_v35, %v1614_v42 }
 0x242   : > { %v3116_v23 = vpop.f32.mrf.mxu1  ;;  %v3086_v43 = vpop.f32.mrf.mxu0 }
 0x243   : > { %v3995_v30 = vadd.f32 %v1857_v50, %v1775_v40 }
 0x244   : > { %v1878_v24 = vpop.f32.mrf.mxu1  ;;  %v1743_v47 = vpop.f32.mrf.mxu0 }
 0x245   : > { %v1776_v28 = vadd.f32 %v1743_v47, %v1615_v55 }
 0x246   : > { %v3119_v49 = vpop.f32.mrf.mxu1  ;;  %v3089_v57 = vpop.f32.mrf.mxu0 }
 0x247   : > { %v3997_v52 = vadd.f32 %v1862_v16, %v1776_v28 }
 0x248   : > { %v1881_v32 = vpop.f32.mrf.mxu1  ;;  %v1746_v36 = vpop.f32.mrf.mxu0 }
 0x249   : > { %v1777_v54 = vadd.f32 %v1746_v36, %v1616_v1 }
 0x24a   : > { %v3120_v21 = vpop.f32.mrf.mxu1  ;;  %v3090_v60 = vpop.f32.mrf.mxu0 }
 0x24b   : > { %v3999_v44 = vadd.f32 %v1865_v22, %v1777_v54 }
 0x24c   : > { %v1886_v61 = vpop.f32.mrf.mxu1  ;;  %v1751_v42 = vpop.f32.mrf.mxu0 }
 0x24d   : > { %v1778_v62 = vadd.f32 %v1751_v42, %v1617_v4 }
 0x24e   : > { %v3123_v0 = vpop.f32.mrf.mxu1  ;;  %v3093_v2 = vpop.f32.mrf.mxu0 }
 0x24f   : > { %v4001_v58 = vadd.f32 %v1870_v6, %v1778_v62 }
 0x250   : > { %v1889_v41 = vpop.f32.mrf.mxu1  ;;  %v1754_v55 = vpop.f32.mrf.mxu0 }
 0x251   : > { %v1779_v3 = vadd.f32 %v1754_v55, %v1618_v8 }
 0x252   : > { %v3124_v38 = vpop.f32.mrf.mxu1  ;;  %v3094_v5 = vpop.f32.mrf.mxu0 }
 0x253   : > { %v4005_v63 = vadd.f32 %v1873_v19, %v1779_v3 }
 0x254   : > { %v4003_v46 = vpop.f32.mrf.mxu1  ;;  %v1759_v1 = vpop.f32.mrf.mxu0 }
 0x255   : > { %v1780_v7 = vadd.f32 %v1759_v1, %v1619_v11 }
 0x256   : > { %v3151_v9 = vpop.f32.mrf.mxu1  ;;  %v3097_v10 = vpop.f32.mrf.mxu0 }
 0x257   : > { %v4009_v4 = vadd.f32 %v1878_v24, %v1780_v7 }
 0x258   : > { %v4007_v39 = vpop.f32.mrf.mxu1  ;;  %v1762_v51 = vpop.f32.mrf.mxu0 }
 0x259   : > { %v1781_v50 = vadd.f32 %v1762_v51, %v1620_v18 }
 0x25a   : > { %v3152_v12 = vpop.f32.mrf.mxu1  ;;  %v3098_v14 = vpop.f32.mrf.mxu0 }
 0x25b   : > { %v4013_v8 = vadd.f32 %v1881_v32, %v1781_v50  ;;  %v4049_v12 = vld [vmem:[%s4150_s6] ss:$0 sm:$0xff] }
 0x25c   : > { %v4011_v15 = vpop.f32.mrf.mxu1  ;;  %v1767_v34 = vpop.f32.mrf.mxu0 }
 0x25d   : > { %v1782_v16 = vadd.f32 %v1767_v34, %v1621_v59 }
 0x25e   : > { %v3155_v37 = vpop.f32.mrf.mxu1  ;;  %v3101_v56 = vpop.f32.mrf.mxu0 }
 0x25f   : > { %v4017_v11 = vadd.f32 %v1886_v61, %v1782_v16 }
 0x260   : > { %v4015_v20 = vpop.f32.mrf.mxu1  ;;  %v1770_v17 = vpop.f32.mrf.mxu0 }
 0x261   : > { %v1783_v22 = vadd.f32 %v1770_v17, %v1622_v29 }
 0x262   : > { %v3156_v45 = vpop.f32.mrf.mxu1  ;;  %v3102_v27 = vpop.f32.mrf.mxu0 }
 0x263   : > { %v4021_v18 = vadd.f32 %v1889_v41, %v1783_v22 }
 0x264   : > { %v4019_v53 = vpop.f32.mrf.mxu1  ;;  %v2007_v13 = vpop.f32.mrf.mxu0 }
 0x265   : > { %v2046_v9 = vadd.f32 %v2007_v13, %v3993_v33  ;;  %v4056_v33 = vld [vmem:[%s4148_s4] ss:$0 sm:$0xff] }
 0x266   : > { %v3159_v6 = vpop.f32.mrf.mxu1  ;;  %v3129_v31 = vpop.f32.mrf.mxu0 }
 0x267   : > { %v2207_v16 = vadd.f32 %v4003_v46, %v2046_v9 }
 0x268   : > { %v4023_v26 = vpop.f32.mrf.mxu1  ;;  %v2010_v59 = vpop.f32.mrf.mxu0 }
 0x269   : > { %v2047_v34 = vadd.f32 %v2010_v59, %v3995_v30 }
 0x26a   : > { %v3160_v25 = vpop.f32.mrf.mxu1  ;;  %v3130_v48 = vpop.f32.mrf.mxu0 }
 0x26b   : > { %v2208_v46 = vadd.f32 %v4007_v39, %v2047_v34 }
 0x26c   : > { %v4025_v19 = vpop.f32.mrf.mxu1  ;;  %v2015_v35 = vpop.f32.mrf.mxu0 }
 0x26d   : > { %v2048_v6 = vadd.f32 %v2015_v35, %v3997_v52 }
 0x26e   : > { %v3163_v40 = vpop.f32.mrf.mxu1  ;;  %v3133_v23 = vpop.f32.mrf.mxu0 }
 0x270   : > { %v4027_v29 = vpop.f32.mrf.mxu1  ;;  %v2018_v43 = vpop.f32.mrf.mxu0 }
 0x272   : > { %v3164_v24 = vpop.f32.mrf.mxu1  ;;  %v3134_v47 = vpop.f32.mrf.mxu0 }
 0x273   : > { %v2049_v47 = vadd.f32 %v2018_v43, %v3999_v44 }
 0x274   : > { %v4029_v28 = vpop.f32.mrf.mxu1  ;;  %v4031_v49 = vpop.f32.mrf.mxu0 }
 0x275   : > { %v2050_v44 = vadd.f32 %v4031_v49, %v4001_v58 }
 0x276   : > { %v3167_v57 = vpop.f32.mrf.mxu1  ;;  %v3137_v32 = vpop.f32.mrf.mxu0 }
 0x277   : > { %v2209_v32 = vadd.f32 %v4011_v15, %v2048_v6  ;;  %v2210_v15 = vadd.f32 %v4015_v20, %v2049_v47 }
 0x278   : > { %v4033_v36 = vpop.f32.mrf.mxu1  ;;  %v4035_v54 = vpop.f32.mrf.mxu0 }
 0x279   : > { %v2051_v49 = vadd.f32 %v4035_v54, %v4005_v63 }
 0x27a   : > { %v3168_v21 = vpop.f32.mrf.mxu1  ;;  %v3138_v60 = vpop.f32.mrf.mxu0 }
 0x27c   : > { %v2449_v61 = vpop.f32.mrf.mxu1  ;;  %v4037_v42 = vpop.f32.mrf.mxu0 }
 0x27d   : > { %v2450_v17 = vadd.f32 %v4049_v12, %v2449_v61 }
 0x27e   : > { %v3195_v62 = vpop.f32.mrf.mxu1  ;;  %v3141_v0 = vpop.f32.mrf.mxu0 }
 0x280   : > { %v2452_v2 = vpop.f32.mrf.mxu1  ;;  %v4039_v41 = vpop.f32.mrf.mxu0 }
 0x281   : > { %v2453_v22 = vadd.f32 %v4049_v12, %v2452_v2 }
 0x282   : > { %v3196_v55 = vpop.f32.mrf.mxu1  ;;  %v3142_v3 = vpop.f32.mrf.mxu0 }
 0x283   : > { %v2493_v48 = vrot.slane %v2453_v22, 7 }
 0x284   : > { %v2457_v38 = vpop.f32.mrf.mxu1  ;;  %v4041_v5 = vpop.f32.mrf.mxu0 }
 0x285   : > { %v2458_v59 = vadd.f32 %v4049_v12, %v2457_v38 }
 0x286   : > { %v3199_v1 = vpop.f32.mrf.mxu1  ;;  %v3145_v7 = vpop.f32.mrf.mxu0 }
 0x287   : > { %v2494_v60 = vrot.slane %v2458_v59, 7  ;;  %v2509_v62 = vrot.slane %v2458_v59, 6 }
 0x288   : > { %v2460_v10 = vpop.f32.mrf.mxu1  ;;  %v4044_v51 = vpop.f32.mrf.mxu0 }
 0x289   : > { %v2461_v35 = vadd.f32 %v4049_v12, %v2460_v10  ;;  %v2495_v9 = vsel %vm1071_vm5, %v2493_v48, %v2494_v60  ;;  %vm4265_vm5 = vcmask 58368  }
 0x28a   : > { %v3200_v50 = vpop.f32.mrf.mxu1  ;;  %v3146_v14 = vpop.f32.mrf.mxu0 }
 0x28b   : > { %v2510_v3 = vrot.slane %v2461_v35, 6  ;;  %v2524_v14 = vrot.slane %v2461_v35, 5 }
 0x28c   : > { %v2465_v37 = vpop.f32.mrf.mxu1  ;;  %v2287_v56 = vpop.f32.mrf.mxu0 }
 0x28d   : > { %v2326_v45 = vadd.f32 %v2287_v56, %v2207_v16  ;;  %v2466_v10 = vadd.f32 %v4049_v12, %v2465_v37  ;;  %v2511_v20 = vsel %vm4264_vm11, %v2509_v62, %v2510_v3 }
 0x28e   : > { %v3203_v27 = vpop.f32.mrf.mxu1  ;;  %v3173_v13 = vpop.f32.mrf.mxu0 }
 0x28f   : > { %v2343_v30 = vadd.f32 %v4056_v33, %v2326_v45  ;;  %v2211_v13 = vadd.f32 %v4019_v53, %v2050_v44  ;;  %v2052_v53 = vadd.f32 %v4037_v42, %v4009_v4 }
 0x290   : > { %v2468_v31 = vpop.f32.mrf.mxu1  ;;  %v2290_v25 = vpop.f32.mrf.mxu0 }
 0x291   : > { %v2487_v40 = vadd.f32 %v2450_v17, %v2343_v30  ;;  %v2327_v23 = vadd.f32 %v2290_v25, %v2208_v46  ;;  %v2469_v22 = vadd.f32 %v4049_v12, %v2468_v31  ;;  %v2525_v30 = vrot.slane %v2466_v10, 5 }
 0x292   : > { %v3204_v24 = vpop.f32.mrf.mxu1  ;;  %v3174_v52 = vpop.f32.mrf.mxu0  ;;  %v2539_v31 = vrot.slane %v2466_v10, 4 }
 0x293   : > { %v2488_v39 = vmax.f32 %v2487_v40, 0.0  ;;  %v2344_v57 = vadd.f32 %v4056_v33, %v2327_v23  ;;  %v2212_v23 = vadd.f32 %v4023_v26, %v2051_v49  ;;  %v2549_v3 = vrot.slane %v2469_v22, 3 }
 0x294   : > { %v2473_v21 = vpop.f32.mrf.mxu1  ;;  %v2295_v61 = vpop.f32.mrf.mxu0 }
 0x295   : > { %2489 = vst.msk [vmem:[%s4068_s23] sm:$0xff] %vm4263_vm10, %v2488_v39  ;;  %v2498_v0 = vadd.f32 %v2493_v48, %v2344_v57  ;;  %v2328_v2 = vadd.f32 %v2295_v61, %v2209_v32  ;;  %v2540_v48 = vrot.slane %v2469_v22, 4  ;;  %v2526_v39 = vsel %vm4266_vm3, %v2524_v14, %v2525_v30 }
 0x296   : > { %v3207_v55 = vpop.f32.mrf.mxu1  ;;  %v3177_v38 = vpop.f32.mrf.mxu0  ;;  %v2474_v57 = vadd.f32 %v4049_v12, %v2473_v21 }
 0x297   : > { %v2500_v43 = vmax.f32 %v2498_v0, 0.0  ;;  %v2345_v1 = vadd.f32 %v4056_v33, %v2328_v2  ;;  %v2541_v4 = vsel %vm4268_vm8, %v2539_v31, %v2540_v48  ;;  %v2053_v0 = vadd.f32 %v4039_v41, %v4013_v8 }
 0x298   : > { %v2476_v7 = vpop.f32.mrf.mxu1  ;;  %v2298_v50 = vpop.f32.mrf.mxu0  ;;  %v2213_v55 = vadd.f32 %v4025_v19, %v2052_v53  ;;  %v2550_v38 = vrot.slane %v2474_v57, 3 }
 0x299   : > { %2796 = vst.msk [vmem:[%s4068_s23 + $0x6] sm:$0xfc] %vm2503_vm14, %v2500_v43  ;;  %v2499_v34 = vadd.f32 %v2495_v9, %v2345_v1  ;;  %v2514_v16 = vadd.f32 %v2509_v62, %v2345_v1  ;;  %v2329_v56 = vadd.f32 %v2298_v50, %v2210_v15  ;;  %v2477_v62 = vadd.f32 %v4049_v12, %v2476_v7 }
 0x29a   : > { %v3208_v58 = vpop.f32.mrf.mxu1  ;;  %v3178_v17 = vpop.f32.mrf.mxu0  ;;  %v2563_v15 = vrot.slane %v2474_v57, 2  ;;  %v2054_v7 = vadd.f32 %v4041_v5, %v4017_v11  ;;  %v2214_v50 = vadd.f32 %v4027_v29, %v2053_v0  ;;  %v2551_v19 = vsel %vm2223_vm12, %v2549_v3, %v2550_v38  ;;  %vm4271_vm12 = vmmov %vm4265_vm5 }
 0x29b   : > { %v2501_v37 = vmax.f32 %v2499_v34, 0.0  ;;  %v2516_v45 = vmax.f32 %v2514_v16, 0.0  ;;  %v2346_v27 = vadd.f32 %v4056_v33, %v2329_v56  ;;  %v2564_v9 = vrot.slane %v2477_v62, 2 }
 0x29c   : > { %v2481_v6 = vpop.f32.mrf.mxu1  ;;  %v2303_v46 = vpop.f32.mrf.mxu0  ;;  %v2055_v11 = vadd.f32 %v4044_v51, %v4021_v18  ;;  %v2215_v29 = vadd.f32 %v4029_v28, %v2054_v7  ;;  %v2577_v17 = vrot.slane %v2477_v62, 1 }
 0x29d   : > { %2797 = vst.msk [vmem:[%s4068_s23 + $0xe] sm:$0x3] %vm4265_vm5, %v2501_v37  ;;  %v2515_v63 = vadd.f32 %v2511_v20, %v2346_v27  ;;  %v2529_v54 = vadd.f32 %v2524_v14, %v2346_v27  ;;  %v2330_v59 = vadd.f32 %v2303_v46, %v2211_v13  ;;  %v2482_v14 = vadd.f32 %v4049_v12, %v2481_v6 }
 0x29e   : > { %2798 = vst.msk [vmem:[%s4068_s23 + $0xc] sm:$0xf0] %vm2519_vm2, %v2516_v45  ;;  %v3211_v25 = vpop.f32.mrf.mxu1  ;;  %v3181_v40 = vpop.f32.mrf.mxu0  ;;  %v2565_v58 = vsel %vm1790_vm0, %v2563_v15, %v2564_v9  ;;  %v2216_v30 = vadd.f32 %v4033_v36, %v2055_v11  ;;  %vm4270_vm0 = vcmask 1046528  }
 0x29f   : > { %v2517_v24 = vmax.f32 %v2515_v63, 0.0  ;;  %v2531_v52 = vmax.f32 %v2529_v54, 0.0  ;;  %v2347_v35 = vadd.f32 %v4056_v33, %v2330_v59  ;;  %v2578_v12 = vrot.slane %v2482_v14, 1 }
 0x2a0   : > { %v2484_v47 = vpop.f32.mrf.mxu1  ;;  %v2306_v32 = vpop.f32.mrf.mxu0 }
 0x2a1   : > { %2799 = vst.msk [vmem:[%s4068_s23 + $0x14] sm:$0xf] %vm4267_vm13, %v2517_v24  ;;  %v2530_v60 = vadd.f32 %v2526_v39, %v2347_v35  ;;  %v2331_v26 = vadd.f32 %v2306_v32, %v2212_v23  ;;  %v2579_v28 = vsel %vm4270_vm0, %v2577_v17, %v2578_v12 }
 0x2a2   : > { %2800 = vst.msk [vmem:[%s4068_s23 + $0x12] sm:$0xc0] %vm2534_vm9, %v2531_v52  ;;  %v3212_v61 = vpop.f32.mrf.mxu1  ;;  %v3182_v42 = vpop.f32.mrf.mxu0 }
 0x2a3   : > { %v2532_v2 = vmax.f32 %v2530_v60, 0.0  ;;  %v2348_v21 = vadd.f32 %v4056_v33, %v2331_v26 }
 0x2a4   : > { %v2311_v44 = vpop.f32.mrf.mxu0 }
 0x2a5   : > { %2801 = vst.msk [vmem:[%s4068_s23 + $0x1a] sm:$0x3f] %vm2536_vm15, %v2532_v2  ;;  %v2543_v43 = vadd.f32 %v2541_v4, %v2348_v21  ;;  %v2332_v1 = vadd.f32 %v2311_v44, %v2213_v55 }
 0x2a6   : > { %v3185_v10 = vpop.f32.mrf.mxu0 }
 0x2a7   : > { %v2544_v8 = vmax.f32 %v2543_v43, 0.0  ;;  %v2349_v41 = vadd.f32 %v4056_v33, %v2332_v1 }
 0x2a8   : > { %v2314_v34 = vpop.f32.mrf.mxu0 }
 0x2a9   : > { %2802 = vst.msk [vmem:[%s4068_s23 + $0x20] sm:$0xff] %vm4269_vm4, %v2544_v8  ;;  %v2554_v16 = vadd.f32 %v2551_v19, %v2349_v41  ;;  %v2333_v56 = vadd.f32 %v2314_v34, %v2214_v50 }
 0x2aa   : > { %v3186_v49 = vpop.f32.mrf.mxu0 }
 0x2ab   : > { %v2556_v5 = vmax.f32 %v2554_v16, 0.0  ;;  %v2350_v20 = vadd.f32 %v4056_v33, %v2333_v56 }
 0x2ac   : > { %v2319_v22 = vpop.f32.mrf.mxu0 }
 0x2ad   : > { %2803 = vst.msk [vmem:[%s4068_s23 + $0x26] sm:$0xfc] %vm2503_vm14, %v2556_v5  ;;  %v2555_v37 = vadd.f32 %v2550_v38, %v2350_v20  ;;  %v2568_v45 = vadd.f32 %v2565_v58, %v2350_v20  ;;  %v2334_v27 = vadd.f32 %v2319_v22, %v2215_v29 }
 0x2ae   : > { %v3189_v13 = vpop.f32.mrf.mxu0 }
 0x2af   : > { %v2557_v6 = vmax.f32 %v2555_v37, 0.0  ;;  %v2570_v18 = vmax.f32 %v2568_v45, 0.0  ;;  %v2351_v51 = vadd.f32 %v4056_v33, %v2334_v27 }
 0x2b0   : > { %v2322_v46 = vpop.f32.mrf.mxu0 }
 0x2b1   : > { %2804 = vst.msk [vmem:[%s4068_s23 + $0x2e] sm:$0x3] %vm4271_vm12, %v2557_v6  ;;  %v2569_v63 = vadd.f32 %v2564_v9, %v2351_v51  ;;  %v2582_v54 = vadd.f32 %v2579_v28, %v2351_v51  ;;  %v2335_v59 = vadd.f32 %v2322_v46, %v2216_v30 }
 0x2b2   : > { %2805 = vst.msk [vmem:[%s4068_s23 + $0x2c] sm:$0xf0] %vm2519_vm2, %v2570_v18  ;;  %v3190_v25 = vpop.f32.mrf.mxu0 }
 0x2b3   : > { %v2571_v31 = vmax.f32 %v2569_v63, 0.0  ;;  %v2584_v48 = vmax.f32 %v2582_v54, 0.0  ;;  %v2352_v40 = vadd.f32 %v4056_v33, %v2335_v59 }
 0x2b5   : > { %2806 = vst.msk [vmem:[%s4068_s23 + $0x34] sm:$0xf] %vm4272_vm1, %v2571_v31  ;;  %v2583_v36 = vadd.f32 %v2578_v12, %v2352_v40 }
 0x2b6   : > { %2807 = vst.msk [vmem:[%s4068_s23 + $0x32] sm:$0xc0] %vm2534_vm9, %v2584_v48 }
 0x2b7   : > { %v2585_v23 = vmax.f32 %v2583_v36, 0.0 }
 0x2b9   : > { %2808 = vst.msk [vmem:[%s4068_s23 + $0x3a] sm:$0x3f] %vm2536_vm15, %v2585_v23 }
 0x2ba PF: > { %s17_s24 = sadd.s32 1, %s3276_s24  }
 0x2bb   : > { %p14_p4 = scmp.ge.s32.totalorder %s17_s24, 4  }
 0x2bd   :  { %16 = sbr.rel (!%p14_p4) target bundleno = 1 (0x1), region = 96 }

</bundles_post_ra>
